<compile_context>
chip_gen: v6e
topology: v6e:2x2x1
jax: 0.10.0
libtpu: 0.0.40
codegen_flags: <defaults>
</compile_context>

<pallas_src>
import functools

import jax
import jax.numpy as jnp
from jax import lax
from jax.experimental import pallas as pl
from jax.experimental.pallas import tpu as pltpu


def mha_kernel(x_ref, wqkv_ref, wp_ref, bp_ref, o_ref, qkv_ref, ctx_ref, *,
               num_heads, head_size):
    """One grid step == `block_batch` batch elements.

    x_ref    : (Bblk, T, C)   input slab
    wqkv_ref : (C, 3*C)       stacked [Q | K | V] weights (already W.T per head;
                              softmax scale pre-folded into the Q columns)
    wp_ref   : (C, C)         output projection weight, already transposed (W.T)
    bp_ref   : (1, C)         output projection bias
    o_ref    : (Bblk, T, C)   output slab
    qkv_ref  : (M, 3*C) VMEM scratch, storage dtype (M = Bblk*T)
    ctx_ref  : (M, C)   VMEM scratch, storage dtype (per-head context slabs)
    """
    Bblk, T, C = x_ref.shape
    H, S = num_heads, head_size
    M = Bblk * T

    # --- fused full-width QKV projection, f32 accumulate, staged to VMEM ---
    x2d = x_ref[...].reshape(M, C)
    qkv_ref[...] = jnp.dot(
        x2d, wqkv_ref[...], preferred_element_type=jnp.float32
    ).astype(qkv_ref.dtype)

    # Causal mask shared across batch and heads.  Large finite negative instead
    # of -inf so a future padding/key mask cannot produce NaN rows.
    row = lax.broadcasted_iota(jnp.int32, (T, T), 0)
    col = lax.broadcasted_iota(jnp.int32, (T, T), 1)
    causal = (col <= row)[None]               # (1, T, T), broadcasts over batch
    neg_big = jnp.float32(-1e30)

    for h in range(H):                        # static unroll; per-head temps die each iter
        # Slices come from the VMEM scratch ref (cheap loads, storage dtype).
        # Softmax scale is already folded into the Q weight columns.
        q = qkv_ref[:, pl.ds(h * S, S)].reshape(Bblk, T, S)
        k = qkv_ref[:, pl.ds(C + h * S, S)].reshape(Bblk, T, S)
        v = qkv_ref[:, pl.ds(2 * C + h * S, S)].reshape(Bblk, T, S)

        # batched attention scores: operands in storage dtype, f32 accumulation
        s = jnp.einsum('btd,bud->btu', q, k, preferred_element_type=jnp.float32)
        s = jnp.where(causal, s, neg_big)
        s = s - jnp.max(s, axis=-1, keepdims=True)
        p = jnp.exp(s)                                            # unnormalized, f32
        denom = jnp.sum(p, axis=-1, keepdims=True)                # (Bblk, T, 1) f32

        ctx = jnp.einsum('btu,bud->btd', p.astype(v.dtype), v,
                         preferred_element_type=jnp.float32)
        # deferred softmax normalization: one O(T*S) multiply, reciprocal on EUP
        ctx = ctx * pl.reciprocal(denom, approx=True)

        # Stage this head's context into its column slab of the (M, C) scratch;
        # the output projection becomes ONE full-K matmul after the loop.
        ctx_ref[:, pl.ds(h * S, S)] = ctx.reshape(M, S).astype(ctx_ref.dtype)

    # --- single full-depth output projection: (M, C) @ (C, C), f32 accumulate ---
    y = jnp.dot(ctx_ref[...], wp_ref[...], preferred_element_type=jnp.float32)
    y = y + bp_ref[...].astype(jnp.float32)
    # attention / output dropout (p=0.1): identity (eval mode)
    o_ref[...] = y.reshape(Bblk, T, C).astype(o_ref.dtype)


def _block_vmem_bytes(bblk, T, C, x_itemsize, w_itemsize, weight_bufs=1):
    """Rough per-step VMEM footprint for a candidate block_batch."""
    M = bblk * T
    io = 2 * 2 * bblk * T * C * x_itemsize        # double-buffered x and o slabs
    w = weight_bufs * (3 * C * C + C * C + C) * w_itemsize
    scratch = (M * 3 * C + M * C) * x_itemsize    # qkv + ctx VMEM scratch
    scores = 3 * bblk * T * T * 4                 # live f32 score/softmax temps (headroom)
    return io + w + scratch + scores


def _choose_block(B, T, C, x_itemsize, w_itemsize, weight_bufs=1):
    """Generation-aware block sizing + vmem limit."""
    try:
        vmem_cap = int(pltpu.get_tpu_info().vmem_capacity_bytes)
    except Exception:
        vmem_cap = 128 * 1024 * 1024
    small_vmem = vmem_cap <= 64 * 1024 * 1024     # v7x-like: 2 TCs, 64 MiB each
    min_steps = 4 if small_vmem else 1            # >= 2 steps per TC on v7x
    target_rows = 256 if small_vmem else 1024     # bigger blocks on 128 MiB parts
    budget = vmem_cap * 3 // 4                    # ~48 MiB on v7x, ~96 MiB on v5e/v6e

    divisors = [d for d in range(1, B + 1) if B % d == 0]
    fitting = [d for d in divisors
               if d * T <= target_rows
               and _block_vmem_bytes(d, T, C, x_itemsize, w_itemsize, weight_bufs) <= budget]
    if not fitting:
        fitting = [1]
    preferred = [d for d in fitting if B // d >= min_steps]
    bblk = max(preferred) if preferred else max(fitting)

    need = _block_vmem_bytes(bblk, T, C, x_itemsize, w_itemsize, weight_bufs)
    vmem_limit = int(min(budget, max(2 * need, 32 * 1024 * 1024)))
    return bblk, vmem_limit


def _weight_spec(shape, index_map):
    """Weights are fetched once (constant index_map): single-buffer them."""
    try:
        return pl.BlockSpec(shape, index_map, pipeline_mode=pl.Buffered(1))
    except TypeError:   # older JAX without pipeline_mode support
        return pl.BlockSpec(shape, index_map)


def multi_head_attention(x, wq, wk, wv, wp, bp, *, block_batch=None):
    """x: (B, T, C); wq/wk/wv: (H, S, C) PyTorch-layout Linear weights;
    wp: (C, C); bp: (C,).

    NOTE: for real deployments keep C a multiple of 128 (lane-dense stores);
    the demo shapes below are sub-tile and unrepresentative for profiling."""
    B, T, C = x.shape
    H, S, _ = wq.shape
    assert H * S == C

    # Restack per-head weights as (C, H*S) so column block h equals w[h].T, then
    # concatenate Q|K|V into one (C, 3C) weight for a single fused matmul.
    # The PyTorch module scales scores by n_embd**-0.5 (== C**-0.5), NOT
    # head_size**-0.5; that scale is folded into the Q weight columns (free).
    def stack(w):
        return jnp.transpose(w, (2, 0, 1)).reshape(C, H * S)

    scale = jnp.asarray(C ** (-0.5), wq.dtype)
    wqkv = jnp.concatenate([stack(wq) * scale, stack(wk), stack(wv)], axis=1)  # (C, 3C)
    wp_t = wp.T                                                                # (C, C)
    bp_2d = bp.reshape(1, C)

    x_itemsize = jnp.dtype(x.dtype).itemsize
    w_itemsize = jnp.dtype(wqkv.dtype).itemsize
    auto_bblk, vmem_limit = _choose_block(B, T, C, x_itemsize, w_itemsize, weight_bufs=1)
    if block_batch is None:
        block_batch = auto_bblk
    assert B % block_batch == 0
    grid = (B // block_batch,)
    M = block_batch * T

    cost = pl.CostEstimate(
        flops=int(B * (8 * T * C * C + 4 * T * T * C)),     # qkv + scores + pv + proj
        transcendentals=int(B * H * T * T),                 # exp
        bytes_accessed=int(2 * B * T * C * x_itemsize + (4 * C * C + C) * w_itemsize),
    )

    kernel = functools.partial(mha_kernel, num_heads=H, head_size=S)
    return pl.pallas_call(
        kernel,
        out_shape=jax.ShapeDtypeStruct((B, T, C), x.dtype),
        grid=grid,
        in_specs=[
            pl.BlockSpec((block_batch, T, C), lambda b: (b, 0, 0)),
            _weight_spec((C, 3 * C), lambda b: (0, 0)),
            _weight_spec((C, C), lambda b: (0, 0)),
            _weight_spec((1, C), lambda b: (0, 0)),
        ],
        out_specs=pl.BlockSpec((block_batch, T, C), lambda b: (b, 0, 0)),
        scratch_shapes=[
            pltpu.VMEM((M, 3 * C), x.dtype),   # staged qkv (storage dtype -> bf16 MXU rate)
            pltpu.VMEM((M, C), x.dtype),       # per-head context slabs -> one projection matmul
        ],
        compiler_params=pltpu.CompilerParams(
            dimension_semantics=("parallel",),
            vmem_limit_bytes=vmem_limit,
        ),
        cost_estimate=cost,
    )(x, wqkv, wp_t, bp_2d)


def reference_mha(x, wq, wk, wv, wp, bp):
    """Pure-JAX reference matching the PyTorch forward exactly (eval mode)."""
    B, T, C = x.shape
    H, S, _ = wq.shape
    scale = C ** (-0.5)
    mask = jnp.tril(jnp.ones((T, T), dtype=bool))
    outs = []
    for h in range(H):
        q = x @ wq[h].T
        k = x @ wk[h].T
        v = x @ wv[h].T
        wei = jnp.einsum('btd,bud->btu', q, k) * scale
        wei = jnp.where(mask, wei, -jnp.inf)
        wei = jax.nn.softmax(wei, axis=-1)
        outs.append(jnp.einsum('btu,bud->btd', wei, v))
    cat = jnp.concatenate(outs, axis=-1)
    return cat @ wp.T + bp


if __name__ == "__main__":
    # Small shapes consistent with the module (n_embd=C, n_head=H, head_size=C//H).
    # Real config is C=256, H=16, T up to 128 — these demo shapes are deliberately tiny.
    B, T, C = 4, 16, 32
    H, S = 4, C // 4

    key = jax.random.PRNGKey(0)
    kx, kq, kk, kv, kp, kb = jax.random.split(key, 6)

    x = jax.random.normal(kx, (B, T, C), dtype=jnp.float32)
    wq = 0.02 * jax.random.normal(kq, (H, S, C), dtype=jnp.float32)   # Head.query weights
    wk = 0.02 * jax.random.normal(kk, (H, S, C), dtype=jnp.float32)   # Head.key weights
    wv = 0.02 * jax.random.normal(kv, (H, S, C), dtype=jnp.float32)   # Head.value weights
    wp = 0.02 * jax.random.normal(kp, (C, C), dtype=jnp.float32)      # proj weight
    bp = 0.02 * jax.random.normal(kb, (C,), dtype=jnp.float32)        # proj bias

    out = multi_head_attention(x, wq, wk, wv, wp, bp)
    out = jax.block_until_ready(out)

    ref = reference_mha(x, wq, wk, wv, wp, bp)
    assert out.shape == (B, T, C)
    # Tolerance accounts for the EUP approximate reciprocal used for the softmax
    # denominator (well below any bf16-deployment error).
    assert jnp.allclose(out, ref, atol=1e-3, rtol=1e-3), "Pallas kernel mismatch vs reference"

    print("KERNEL_OK")
</pallas_src>

<mosaic_0001>
module attributes {stable_mosaic.version = 11 : i64} {
  func.func @mha_kernel(%arg0: i32, %arg1: memref<4x16x32xf32, #tpu.memory_space<vmem>>, %arg2: memref<32x96xf32, #tpu.memory_space<vmem>>, %arg3: memref<32x32xf32, #tpu.memory_space<vmem>>, %arg4: memref<1x32xf32, #tpu.memory_space<vmem>>, %arg5: memref<4x16x32xf32, #tpu.memory_space<vmem>>, %arg6: memref<64x96xf32, #tpu.memory_space<vmem>>, %arg7: memref<64x32xf32, #tpu.memory_space<vmem>>) attributes {dimension_semantics = [#tpu.dimension_semantics<parallel>], iteration_bounds = array<i64: 1>, scalar_prefetch = 0 : i64, scratch_operands = 2 : i64, tpu.core_type = #tpu.core_type<tc>, window_params = [{transform_indices = @transform_0, window_bounds = array<i64: 4, 16, 32>}, {pipeline_mode = #tpu.pipeline_mode<synchronous>, transform_indices = @transform_1, window_bounds = array<i64: 32, 96>}, {pipeline_mode = #tpu.pipeline_mode<synchronous>, transform_indices = @transform_2, window_bounds = array<i64: 32, 32>}, {pipeline_mode = #tpu.pipeline_mode<synchronous>, transform_indices = @transform_3, window_bounds = array<i64: 1, 32>}, {transform_indices = @transform_4, window_bounds = array<i64: 4, 16, 32>}]} {
    %c0 = arith.constant 0 : index
    %c0_0 = arith.constant 0 : index
    %c0_1 = arith.constant 0 : index
    %0 = vector.load %arg1[%c0, %c0_0, %c0_1] : memref<4x16x32xf32, #tpu.memory_space<vmem>>, vector<4x16x32xf32>
    %1 = vector.shape_cast %0 : vector<4x16x32xf32> to vector<64x32xf32>
    %c0_2 = arith.constant 0 : index
    %c0_3 = arith.constant 0 : index
    %2 = vector.load %arg2[%c0_2, %c0_3] : memref<32x96xf32, #tpu.memory_space<vmem>>, vector<32x96xf32>
    %cst = arith.constant dense<0.000000e+00> : vector<64x96xf32>
    %3 = tpu.matmul %1, %2, %cst {dimension_numbers = #tpu.dot_dimension_numbers<[1], [0], [0], [1], [0, 0, 1, 1], [], []>} : vector<64x32xf32>, vector<32x96xf32>, vector<64x96xf32> -> vector<64x96xf32>
    %c0_4 = arith.constant 0 : index
    %c0_5 = arith.constant 0 : index
    %4 = vector.load %arg6[%c0_4, %c0_5] : memref<64x96xf32, #tpu.memory_space<vmem>>, vector<64x96xf32>
    tpu.vector_store %arg6[%c0_4, %c0_5], %3 {strides = array<i32>} : memref<64x96xf32, #tpu.memory_space<vmem>>, vector<64x96xf32>,
    %5 = tpu.iota {dimensions = array<i32: 0>} : vector<16x16xi32>
    %6 = tpu.iota {dimensions = array<i32: 1>} : vector<16x16xi32>
    %7 = arith.cmpi sle, %6, %5 : vector<16x16xi32>
    %8 = vector.shape_cast %7 : vector<16x16xi1> to vector<1x16x16xi1>
    %c0_6 = arith.constant 0 : index
    %c0_7 = arith.constant 0 : index
    %9 = vector.load %arg6[%c0_6, %c0_7] : memref<64x96xf32, #tpu.memory_space<vmem>>, vector<64x8xf32>
    %10 = vector.shape_cast %9 : vector<64x8xf32> to vector<4x16x8xf32>
    %c0_8 = arith.constant 0 : index
    %c32 = arith.constant 32 : index
    %11 = vector.load %arg6[%c0_8, %c32] : memref<64x96xf32, #tpu.memory_space<vmem>>, vector<64x8xf32>
    %12 = vector.shape_cast %11 : vector<64x8xf32> to vector<4x16x8xf32>
    %c0_9 = arith.constant 0 : index
    %c64 = arith.constant 64 : index
    %13 = vector.load %arg6[%c0_9, %c64] : memref<64x96xf32, #tpu.memory_space<vmem>>, vector<64x8xf32>
    %14 = vector.shape_cast %13 : vector<64x8xf32> to vector<4x16x8xf32>
    "tpu.trace_start"() <{level = 10 : i32, message = "btd,bud->btu"}> : () -> ()
    %cst_10 = arith.constant dense<0.000000e+00> : vector<4x16x16xf32>
    %15 = tpu.matmul %10, %12, %cst_10 {dimension_numbers = #tpu.dot_dimension_numbers<[2], [2], [1], [1], [0, 0, 0, 1, 1, 1], [0], [0]>} : vector<4x16x8xf32>, vector<4x16x8xf32>, vector<4x16x16xf32> -> vector<4x16x16xf32>
    %cst_11 = arith.constant -1.000000e+30 : f32
    "tpu.trace_stop"() : () -> ()
    %16 = vector.shape_cast %8 : vector<1x16x16xi1> to vector<1x16x16xi1>
    %17 = vector.broadcast %16 : vector<1x16x16xi1> to vector<4x16x16xi1>
    %18 = vector.broadcast %cst_11 : f32 to vector<4x16x16xf32>
    %19 = arith.select %17, %15, %18 : vector<4x16x16xi1>, vector<4x16x16xf32>
    %cst_12 = arith.constant dense<0xFF800000> : vector<4x16xf32>
    %20 = vector.multi_reduction <maximumf>, %19, %cst_12 [2] : vector<4x16x16xf32> to vector<4x16xf32>
    %21 = vector.shape_cast %20 : vector<4x16xf32> to vector<4x16x1xf32>
    %22 = vector.broadcast %21 : vector<4x16x1xf32> to vector<4x16x16xf32>
    %23 = arith.subf %19, %22 : vector<4x16x16xf32>
    %24 = math.exp %23 : vector<4x16x16xf32>
    %cst_13 = arith.constant dense<0.000000e+00> : vector<4x16xf32>
    %25 = vector.multi_reduction <add>, %24, %cst_13 [2] : vector<4x16x16xf32> to vector<4x16xf32>
    %26 = vector.shape_cast %25 : vector<4x16xf32> to vector<4x16x1xf32>
    "tpu.trace_start"() <{level = 10 : i32, message = "btu,bud->btd"}> : () -> ()
    %cst_14 = arith.constant dense<0.000000e+00> : vector<4x16x8xf32>
    %27 = tpu.matmul %24, %14, %cst_14 {dimension_numbers = #tpu.dot_dimension_numbers<[2], [1], [1], [2], [0, 0, 0, 1, 1, 2], [0], [0]>} : vector<4x16x16xf32>, vector<4x16x8xf32>, vector<4x16x8xf32> -> vector<4x16x8xf32>
    "tpu.trace_stop"() : () -> ()
    %28 = tpu.reciprocal %26 {approx = true} : vector<4x16x1xf32> -> vector<4x16x1xf32>
    %29 = vector.broadcast %28 : vector<4x16x1xf32> to vector<4x16x8xf32>
    %30 = arith.mulf %27, %29 : vector<4x16x8xf32>
    %31 = vector.shape_cast %30 : vector<4x16x8xf32> to vector<64x8xf32>
    %c0_15 = arith.constant 0 : index
    %c0_16 = arith.constant 0 : index
    %32 = vector.load %arg7[%c0_15, %c0_16] : memref<64x32xf32, #tpu.memory_space<vmem>>, vector<64x8xf32>
    tpu.vector_store %arg7[%c0_15, %c0_16], %31 {strides = array<i32>} : memref<64x32xf32, #tpu.memory_space<vmem>>, vector<64x8xf32>,
    %c0_17 = arith.constant 0 : index
    %c8 = arith.constant 8 : index
    %33 = vector.load %arg6[%c0_17, %c8] : memref<64x96xf32, #tpu.memory_space<vmem>>, vector<64x8xf32>
    %34 = vector.shape_cast %33 : vector<64x8xf32> to vector<4x16x8xf32>
    %c0_18 = arith.constant 0 : index
    %c40 = arith.constant 40 : index
    %35 = vector.load %arg6[%c0_18, %c40] : memref<64x96xf32, #tpu.memory_space<vmem>>, vector<64x8xf32>
    %36 = vector.shape_cast %35 : vector<64x8xf32> to vector<4x16x8xf32>
    %c0_19 = arith.constant 0 : index
    %c72 = arith.constant 72 : index
    %37 = vector.load %arg6[%c0_19, %c72] : memref<64x96xf32, #tpu.memory_space<vmem>>, vector<64x8xf32>
    %38 = vector.shape_cast %37 : vector<64x8xf32> to vector<4x16x8xf32>
    "tpu.trace_start"() <{level = 10 : i32, message = "btd,bud->btu"}> : () -> ()
    %cst_20 = arith.constant dense<0.000000e+00> : vector<4x16x16xf32>
    %39 = tpu.matmul %34, %36, %cst_20 {dimension_numbers = #tpu.dot_dimension_numbers<[2], [2], [1], [1], [0, 0, 0, 1, 1, 1], [0], [0]>} : vector<4x16x8xf32>, vector<4x16x8xf32>, vector<4x16x16xf32> -> vector<4x16x16xf32>
    %cst_21 = arith.constant -1.000000e+30 : f32
    "tpu.trace_stop"() : () -> ()
    %40 = vector.shape_cast %8 : vector<1x16x16xi1> to vector<1x16x16xi1>
    %41 = vector.broadcast %40 : vector<1x16x16xi1> to vector<4x16x16xi1>
    %42 = vector.broadcast %cst_21 : f32 to vector<4x16x16xf32>
    %43 = arith.select %41, %39, %42 : vector<4x16x16xi1>, vector<4x16x16xf32>
    %cst_22 = arith.constant dense<0xFF800000> : vector<4x16xf32>
    %44 = vector.multi_reduction <maximumf>, %43, %cst_22 [2] : vector<4x16x16xf32> to vector<4x16xf32>
    %45 = vector.shape_cast %44 : vector<4x16xf32> to vector<4x16x1xf32>
    %46 = vector.broadcast %45 : vector<4x16x1xf32> to vector<4x16x16xf32>
    %47 = arith.subf %43, %46 : vector<4x16x16xf32>
    %48 = math.exp %47 : vector<4x16x16xf32>
    %cst_23 = arith.constant dense<0.000000e+00> : vector<4x16xf32>
    %49 = vector.multi_reduction <add>, %48, %cst_23 [2] : vector<4x16x16xf32> to vector<4x16xf32>
    %50 = vector.shape_cast %49 : vector<4x16xf32> to vector<4x16x1xf32>
    "tpu.trace_start"() <{level = 10 : i32, message = "btu,bud->btd"}> : () -> ()
    %cst_24 = arith.constant dense<0.000000e+00> : vector<4x16x8xf32>
    %51 = tpu.matmul %48, %38, %cst_24 {dimension_numbers = #tpu.dot_dimension_numbers<[2], [1], [1], [2], [0, 0, 0, 1, 1, 2], [0], [0]>} : vector<4x16x16xf32>, vector<4x16x8xf32>, vector<4x16x8xf32> -> vector<4x16x8xf32>
    "tpu.trace_stop"() : () -> ()
    %52 = tpu.reciprocal %50 {approx = true} : vector<4x16x1xf32> -> vector<4x16x1xf32>
    %53 = vector.broadcast %52 : vector<4x16x1xf32> to vector<4x16x8xf32>
    %54 = arith.mulf %51, %53 : vector<4x16x8xf32>
    %55 = vector.shape_cast %54 : vector<4x16x8xf32> to vector<64x8xf32>
    %c0_25 = arith.constant 0 : index
    %c8_26 = arith.constant 8 : index
    %56 = vector.load %arg7[%c0_25, %c8_26] : memref<64x32xf32, #tpu.memory_space<vmem>>, vector<64x8xf32>
    tpu.vector_store %arg7[%c0_25, %c8_26], %55 {strides = array<i32>} : memref<64x32xf32, #tpu.memory_space<vmem>>, vector<64x8xf32>,
    %c0_27 = arith.constant 0 : index
    %c16 = arith.constant 16 : index
    %57 = vector.load %arg6[%c0_27, %c16] : memref<64x96xf32, #tpu.memory_space<vmem>>, vector<64x8xf32>
    %58 = vector.shape_cast %57 : vector<64x8xf32> to vector<4x16x8xf32>
    %c0_28 = arith.constant 0 : index
    %c48 = arith.constant 48 : index
    %59 = vector.load %arg6[%c0_28, %c48] : memref<64x96xf32, #tpu.memory_space<vmem>>, vector<64x8xf32>
    %60 = vector.shape_cast %59 : vector<64x8xf32> to vector<4x16x8xf32>
    %c0_29 = arith.constant 0 : index
    %c80 = arith.constant 80 : index
    %61 = vector.load %arg6[%c0_29, %c80] : memref<64x96xf32, #tpu.memory_space<vmem>>, vector<64x8xf32>
    %62 = vector.shape_cast %61 : vector<64x8xf32> to vector<4x16x8xf32>
    "tpu.trace_start"() <{level = 10 : i32, message = "btd,bud->btu"}> : () -> ()
    %cst_30 = arith.constant dense<0.000000e+00> : vector<4x16x16xf32>
    %63 = tpu.matmul %58, %60, %cst_30 {dimension_numbers = #tpu.dot_dimension_numbers<[2], [2], [1], [1], [0, 0, 0, 1, 1, 1], [0], [0]>} : vector<4x16x8xf32>, vector<4x16x8xf32>, vector<4x16x16xf32> -> vector<4x16x16xf32>
    %cst_31 = arith.constant -1.000000e+30 : f32
    "tpu.trace_stop"() : () -> ()
    %64 = vector.shape_cast %8 : vector<1x16x16xi1> to vector<1x16x16xi1>
    %65 = vector.broadcast %64 : vector<1x16x16xi1> to vector<4x16x16xi1>
    %66 = vector.broadcast %cst_31 : f32 to vector<4x16x16xf32>
    %67 = arith.select %65, %63, %66 : vector<4x16x16xi1>, vector<4x16x16xf32>
    %cst_32 = arith.constant dense<0xFF800000> : vector<4x16xf32>
    %68 = vector.multi_reduction <maximumf>, %67, %cst_32 [2] : vector<4x16x16xf32> to vector<4x16xf32>
    %69 = vector.shape_cast %68 : vector<4x16xf32> to vector<4x16x1xf32>
    %70 = vector.broadcast %69 : vector<4x16x1xf32> to vector<4x16x16xf32>
    %71 = arith.subf %67, %70 : vector<4x16x16xf32>
    %72 = math.exp %71 : vector<4x16x16xf32>
    %cst_33 = arith.constant dense<0.000000e+00> : vector<4x16xf32>
    %73 = vector.multi_reduction <add>, %72, %cst_33 [2] : vector<4x16x16xf32> to vector<4x16xf32>
    %74 = vector.shape_cast %73 : vector<4x16xf32> to vector<4x16x1xf32>
    "tpu.trace_start"() <{level = 10 : i32, message = "btu,bud->btd"}> : () -> ()
    %cst_34 = arith.constant dense<0.000000e+00> : vector<4x16x8xf32>
    %75 = tpu.matmul %72, %62, %cst_34 {dimension_numbers = #tpu.dot_dimension_numbers<[2], [1], [1], [2], [0, 0, 0, 1, 1, 2], [0], [0]>} : vector<4x16x16xf32>, vector<4x16x8xf32>, vector<4x16x8xf32> -> vector<4x16x8xf32>
    "tpu.trace_stop"() : () -> ()
    %76 = tpu.reciprocal %74 {approx = true} : vector<4x16x1xf32> -> vector<4x16x1xf32>
    %77 = vector.broadcast %76 : vector<4x16x1xf32> to vector<4x16x8xf32>
    %78 = arith.mulf %75, %77 : vector<4x16x8xf32>
    %79 = vector.shape_cast %78 : vector<4x16x8xf32> to vector<64x8xf32>
    %c0_35 = arith.constant 0 : index
    %c16_36 = arith.constant 16 : index
    %80 = vector.load %arg7[%c0_35, %c16_36] : memref<64x32xf32, #tpu.memory_space<vmem>>, vector<64x8xf32>
    tpu.vector_store %arg7[%c0_35, %c16_36], %79 {strides = array<i32>} : memref<64x32xf32, #tpu.memory_space<vmem>>, vector<64x8xf32>,
    %c0_37 = arith.constant 0 : index
    %c24 = arith.constant 24 : index
    %81 = vector.load %arg6[%c0_37, %c24] : memref<64x96xf32, #tpu.memory_space<vmem>>, vector<64x8xf32>
    %82 = vector.shape_cast %81 : vector<64x8xf32> to vector<4x16x8xf32>
    %c0_38 = arith.constant 0 : index
    %c56 = arith.constant 56 : index
    %83 = vector.load %arg6[%c0_38, %c56] : memref<64x96xf32, #tpu.memory_space<vmem>>, vector<64x8xf32>
    %84 = vector.shape_cast %83 : vector<64x8xf32> to vector<4x16x8xf32>
    %c0_39 = arith.constant 0 : index
    %c88 = arith.constant 88 : index
    %85 = vector.load %arg6[%c0_39, %c88] : memref<64x96xf32, #tpu.memory_space<vmem>>, vector<64x8xf32>
    %86 = vector.shape_cast %85 : vector<64x8xf32> to vector<4x16x8xf32>
    "tpu.trace_start"() <{level = 10 : i32, message = "btd,bud->btu"}> : () -> ()
    %cst_40 = arith.constant dense<0.000000e+00> : vector<4x16x16xf32>
    %87 = tpu.matmul %82, %84, %cst_40 {dimension_numbers = #tpu.dot_dimension_numbers<[2], [2], [1], [1], [0, 0, 0, 1, 1, 1], [0], [0]>} : vector<4x16x8xf32>, vector<4x16x8xf32>, vector<4x16x16xf32> -> vector<4x16x16xf32>
    %cst_41 = arith.constant -1.000000e+30 : f32
    "tpu.trace_stop"() : () -> ()
    %88 = vector.shape_cast %8 : vector<1x16x16xi1> to vector<1x16x16xi1>
    %89 = vector.broadcast %88 : vector<1x16x16xi1> to vector<4x16x16xi1>
    %90 = vector.broadcast %cst_41 : f32 to vector<4x16x16xf32>
    %91 = arith.select %89, %87, %90 : vector<4x16x16xi1>, vector<4x16x16xf32>
    %cst_42 = arith.constant dense<0xFF800000> : vector<4x16xf32>
    %92 = vector.multi_reduction <maximumf>, %91, %cst_42 [2] : vector<4x16x16xf32> to vector<4x16xf32>
    %93 = vector.shape_cast %92 : vector<4x16xf32> to vector<4x16x1xf32>
    %94 = vector.broadcast %93 : vector<4x16x1xf32> to vector<4x16x16xf32>
    %95 = arith.subf %91, %94 : vector<4x16x16xf32>
    %96 = math.exp %95 : vector<4x16x16xf32>
    %cst_43 = arith.constant dense<0.000000e+00> : vector<4x16xf32>
    %97 = vector.multi_reduction <add>, %96, %cst_43 [2] : vector<4x16x16xf32> to vector<4x16xf32>
    %98 = vector.shape_cast %97 : vector<4x16xf32> to vector<4x16x1xf32>
    "tpu.trace_start"() <{level = 10 : i32, message = "btu,bud->btd"}> : () -> ()
    %cst_44 = arith.constant dense<0.000000e+00> : vector<4x16x8xf32>
    %99 = tpu.matmul %96, %86, %cst_44 {dimension_numbers = #tpu.dot_dimension_numbers<[2], [1], [1], [2], [0, 0, 0, 1, 1, 2], [0], [0]>} : vector<4x16x16xf32>, vector<4x16x8xf32>, vector<4x16x8xf32> -> vector<4x16x8xf32>
    "tpu.trace_stop"() : () -> ()
    %100 = tpu.reciprocal %98 {approx = true} : vector<4x16x1xf32> -> vector<4x16x1xf32>
    %101 = vector.broadcast %100 : vector<4x16x1xf32> to vector<4x16x8xf32>
    %102 = arith.mulf %99, %101 : vector<4x16x8xf32>
    %103 = vector.shape_cast %102 : vector<4x16x8xf32> to vector<64x8xf32>
    %c0_45 = arith.constant 0 : index
    %c24_46 = arith.constant 24 : index
    %104 = vector.load %arg7[%c0_45, %c24_46] : memref<64x32xf32, #tpu.memory_space<vmem>>, vector<64x8xf32>
    tpu.vector_store %arg7[%c0_45, %c24_46], %103 {strides = array<i32>} : memref<64x32xf32, #tpu.memory_space<vmem>>, vector<64x8xf32>,
    %c0_47 = arith.constant 0 : index
    %c0_48 = arith.constant 0 : index
    %105 = vector.load %arg7[%c0_47, %c0_48] : memref<64x32xf32, #tpu.memory_space<vmem>>, vector<64x32xf32>
    %c0_49 = arith.constant 0 : index
    %c0_50 = arith.constant 0 : index
    %106 = vector.load %arg3[%c0_49, %c0_50] : memref<32x32xf32, #tpu.memory_space<vmem>>, vector<32x32xf32>
    %cst_51 = arith.constant dense<0.000000e+00> : vector<64x32xf32>
    %107 = tpu.matmul %105, %106, %cst_51 {dimension_numbers = #tpu.dot_dimension_numbers<[1], [0], [0], [1], [0, 0, 1, 1], [], []>} : vector<64x32xf32>, vector<32x32xf32>, vector<64x32xf32> -> vector<64x32xf32>
    %c0_52 = arith.constant 0 : index
    %c0_53 = arith.constant 0 : index
    %108 = vector.load %arg4[%c0_52, %c0_53] : memref<1x32xf32, #tpu.memory_space<vmem>>, vector<1x32xf32>
    %109 = vector.broadcast %108 : vector<1x32xf32> to vector<64x32xf32>
    %110 = arith.addf %107, %109 : vector<64x32xf32>
    %111 = vector.shape_cast %110 : vector<64x32xf32> to vector<4x16x32xf32>
    %c0_54 = arith.constant 0 : index
    %c0_55 = arith.constant 0 : index
    %c0_56 = arith.constant 0 : index
    %112 = vector.load %arg5[%c0_54, %c0_55, %c0_56] : memref<4x16x32xf32, #tpu.memory_space<vmem>>, vector<4x16x32xf32>
    tpu.vector_store %arg5[%c0_54, %c0_55, %c0_56], %111 {strides = array<i32>} : memref<4x16x32xf32, #tpu.memory_space<vmem>>, vector<4x16x32xf32>,
    return
  }
  func.func @transform_0(%arg0: i32) -> (i32, i32, i32) {
    %c0_i32 = arith.constant 0 : i32
    %c0_i32_0 = arith.constant 0 : i32
    %c0_i32_1 = arith.constant 0 : i32
    return %arg0, %c0_i32, %c0_i32_0 : i32, i32, i32
  }
  func.func @transform_1(%arg0: i32) -> (i32, i32) {
    %c0_i32 = arith.constant 0 : i32
    %c0_i32_0 = arith.constant 0 : i32
    %c0_i32_1 = arith.constant 0 : i32
    return %c0_i32, %c0_i32_0 : i32, i32
  }
  func.func @transform_2(%arg0: i32) -> (i32, i32) {
    %c0_i32 = arith.constant 0 : i32
    %c0_i32_0 = arith.constant 0 : i32
    %c0_i32_1 = arith.constant 0 : i32
    return %c0_i32, %c0_i32_0 : i32, i32
  }
  func.func @transform_3(%arg0: i32) -> (i32, i32) {
    %c0_i32 = arith.constant 0 : i32
    %c0_i32_0 = arith.constant 0 : i32
    %c0_i32_1 = arith.constant 0 : i32
    return %c0_i32, %c0_i32_0 : i32, i32
  }
  func.func @transform_4(%arg0: i32) -> (i32, i32, i32) {
    %c0_i32 = arith.constant 0 : i32
    %c0_i32_0 = arith.constant 0 : i32
    %c0_i32_1 = arith.constant 0 : i32
    return %arg0, %c0_i32, %c0_i32_0 : i32, i32, i32
  }
}

</mosaic_0001>

<bundles_post_ra>
// kernel: tpu_custom_call.1
= control target key start
LH: loop header
LB: loop body
LE: loop exit
PB: predicated region body
PF: predicated region fallthrough
CT: control target
= control target key end

     0   :  { %9 = vsyncpa [#allocation5], 0  ;;  %s5531_s0 = inlined_call_operand.hbm [shape: f32[4,16,32], index: 0, kind: input, shape index: {}]   ;;  %s5532_s1 = inlined_call_operand.hbm [shape: f32[32,96], index: 1, kind: input, shape index: {}]   ;;  %s5533_s2 = inlined_call_operand.hbm [shape: f32[32,32], index: 2, kind: input, shape index: {}]   ;;  %s5534_s3 = inlined_call_operand.vmem [shape: f32[1,32], index: 3, kind: input, shape index: {}]   ;;  %s5535_s4 = inlined_call_operand.hbm [shape: f32[4,16,32], index: 4, kind: output, shape index: {}]  }
   0x1   :  { %10 = vsyncpa [#allocation8], 0 }
   0x2   :  { %11 = vsyncpa [#allocation6], 0  ;;  %s4580_s15 = smov [#allocation7]   ;;  %s4581_s17 = smov [#allocation4]  }
   0x3   :  { %s29_s16 = sshll.u32 %s4580_s15, 4  ;;  %s17_s18 = sshll.u32 %s4581_s17, 4  ;;  %s30_s16 = int_to_ptr.vmem [resolvable:$true] %s29_s16  ;;  %s18_s18 = int_to_ptr.vmem [resolvable:$true] %s17_s18 }
   0x4   :  { %s4502_s19 = scalar_lea.vmem %s30_s16, 512  ;;  %p4507_p1 = scmp.lt.s32.totalorder %s30_s16, %s30_s16 }
   0x5   :  { %p4503_p0 = scmp.ne.s32.totalorder %s30_s16, %s4502_s19  ;;  %p4508_p2 = scmp.lt.s32.totalorder %s4502_s19, %s4502_s19 }
   0x7   :  { %p4509_p3 = por %p4508_p2, %p4507_p1 }
   0x9   :  { %p4510_p4 = pnand %p4509_p3, %p4503_p0 }
   0xb   :  { %4513 = shalt.err (!%p4510_p4)
}
   0xc   :  { %s4582_s20 = smov 128   ;;  %s4583_s21 = smov 8  }
   0xd   :  { %35 = dma.hbm_to_vmem [thread:$0]  %s5532_s1, 512, %s30_s16, [#allocation8], %s4582_s20, %s4582_s20, %s4583_s21  }
   0xe   :  { %s4522_s24 = scalar_lea.vmem %s18_s18, 1024  ;;  %p4527_p6 = scmp.lt.s32.totalorder %s18_s18, %s18_s18 }
   0xf   :  { %p4523_p5 = scmp.ne.s32.totalorder %s18_s18, %s4522_s24  ;;  %p4528_p7 = scmp.lt.s32.totalorder %s4522_s24, %s4522_s24 }
  0x11   :  { %p4529_p8 = por %p4528_p7, %p4527_p6 }
  0x13   :  { %p4530_p9 = pnand %p4529_p8, %p4523_p5 }
  0x15   :  { %4533 = shalt.err (!%p4530_p9)
}
  0x16   :  { %23 = dma.hbm_to_vmem [thread:$0]  %s5531_s0, 1024, %s18_s18, [#allocation5], %s4582_s20, %s4582_s20, %s4583_s21  }
  0x17   :  { %s4584_s27 = smov [#allocation9]  }
  0x18   :  { %s41_s28 = sshll.u32 %s4584_s27, 4  ;;  %s42_s28 = int_to_ptr.vmem [resolvable:$true] %s41_s28 }
  0x19   :  { %s4542_s29 = scalar_lea.vmem %s42_s28, 512  ;;  %p4547_p11 = scmp.lt.s32.totalorder %s42_s28, %s42_s28 }
  0x1a   :  { %p4543_p10 = scmp.ne.s32.totalorder %s42_s28, %s4542_s29  ;;  %p4548_p12 = scmp.lt.s32.totalorder %s4542_s29, %s4542_s29 }
  0x1c   :  { %p4549_p13 = por %p4548_p12, %p4547_p11 }
  0x1e   :  { %p4550_p0 = pnand %p4549_p13, %p4543_p10 }
  0x20   :  { %4553 = shalt.err (!%p4550_p0)
}
  0x21   :  { %47 = dma.hbm_to_vmem [thread:$0]  %s5533_s2, 512, %s42_s28, [#allocation8], %s4582_s20, %s4582_s20, %s4583_s21  }
  0x22   :  { %4574 = dma.done.wait [#allocation5], 1024  }
  0x23   :  { %4575 = vsyncadd [#allocation5], 4294966272 }
  0x24   :  { %4576 = dma.done.wait [#allocation8], 1024  }
  0x25   :  { %4577 = vsyncadd [#allocation8], 4294966272  ;;  %vm71_vm0 = vcmask 261120   ;;  %v70_v0 = vld [vmem:[#allocation7 + $0x18] sm:$0xff]  ;;  %v69_v1 = vld [vmem:[#allocation7 + $0x10] sm:$0xff]  ;;  %vm201_vm1 = vcmask 785408   ;;  %v210_v43 = vlaneseq }
  0x26   :  { %4073 = vmatprep.subr.mxu0 %v70_v0  ;;  %v59_v2 = vld [vmem:[#allocation4] sm:$0xff]  ;;  %4337 = vmatprep.subr.mxu1 %v70_v0  ;;  %v68_v3 = vld [vmem:[#allocation7 + $0x8] sm:$0xff]  ;;  %v61_v6 = vld [vmem:[#allocation4 + $0x10] sm:$0xff]  ;;  %vm231_vm2 = vcmask 64512   ;;  %s4585_s0 = smov 96   ;;  %s4586_s2 = smov 64  }
  0x27   :  { %4074 = vmatpush3.msra.mxu0 %v70_v0  ;;  %4081 = vmatprep.mubr.msk.f32.mxu0 %vm71_vm0, %v59_v2  ;;  %v67_v4 = vld [vmem:[#allocation7] sm:$0xff]  ;;  %v60_v5 = vld [vmem:[#allocation4 + $0x8] sm:$0xff]  ;;  %v65_v9 = vld [vmem:[#allocation4 + $0x30] sm:$0xff]  ;;  %s4587_s5 = smov 88   ;;  %s4588_s6 = smov 120   ;;  %v211_v44 = vshrl.u32 %v210_v43, 7 }
  0x28   :  { %4075 = vmatprep.subr.mxu0 %v69_v1  ;;  %4341 = vmatpush3.msra.mxu1 %v70_v0  ;;  %v63_v7 = vld [vmem:[#allocation4 + $0x20] sm:$0xff]  ;;  %v64_v8 = vld [vmem:[#allocation4 + $0x28] sm:$0xff]  ;;  %v62_v10 = vld [vmem:[#allocation4 + $0x18] sm:$0xff]  ;;  %v214_v46 = vand.u32 127, %v210_v43  ;;  %vm594_vm4 = vcmask 130048   ;;  %s4589_s7 = smov 56  }
  0x29   :  { %4076 = vmatpush3.msra.mxu0 %v69_v1  ;;  %4338 = vmatprep.subr.mxu1 %v69_v1  ;;  %v66_v11 = vld [vmem:[#allocation4 + $0x38] sm:$0xff]  ;;  %v212_v45 = vadd.s32 8, %v211_v44  ;;  %s4590_s8 = smov 80   ;;  %s4591_s9 = smov 112   ;;  %vm1895_vm6 = vcmask 130112   ;;  %vm2760_vm7 = vcmask 195712  }
  0x2a   :  { %4077 = vmatprep.subr.mxu0 %v68_v3  ;;  %4342 = vmatpush3.msra.mxu1 %v69_v1  ;;  %vm4752_vm5 = vcmp.le.s32.totalorder %v214_v46, %v211_v44  ;;  %s4592_s10 = smov 48   ;;  %s4593_s11 = smov 72   ;;  %vm3625_vm8 = vcmask 261312  }
  0x2b   :  { %4078 = vmatpush3.msra.mxu0 %v68_v3  ;;  %4339 = vmatprep.subr.mxu1 %v68_v3  ;;  %vm4742_vm3 = vcmp.le.s32.totalorder %v214_v46, %v212_v45  ;;  %s4594_s12 = smov 104   ;;  %s4595_s13 = smov 40  }
  0x2c   :  { %4079 = vmatprep.subr.mxu0 %v67_v4  ;;  %4343 = vmatpush3.msra.mxu1 %v68_v3  ;;  %s4596_s14 = smov 16   ;;  %s4597_s15 = smov 24  }
  0x2d   :  { %4080 = vmatpush3.msra.mxu0 %v67_v4  ;;  %4340 = vmatprep.subr.mxu1 %v67_v4 }
  0x2e   :  { %4082 = vmatmul.mubr.msk.f32.vlgmr.msra.gmra.mxu0 %vm71_vm0, %v60_v5  ;;  %4344 = vmatpush3.msra.mxu1 %v67_v4 }
  0x2f   :  { %4084 = vmatprep.mubr.msk.f32.mxu0 %vm71_vm0, %v61_v6  ;;  %4087 = vmatprep.mubr.msk.f32.mxu1 %vm71_vm0, %v63_v7 }
  0x30   :  { %4088 = vmatmul.mubr.msk.f32.vlgmr.msra.gmra.mxu1 %vm71_vm0, %v64_v8 }
  0x31   :  { %4090 = vmatprep.mubr.msk.f32.mxu1 %vm71_vm0, %v65_v9 }
  0x32   :  { %4085 = vmatmul.mubr.msk.f32.gmra.mxu0 %vm71_vm0, %v62_v10 }
  0x34   :  { %4091 = vmatmul.mubr.msk.f32.gmra.mxu1 %vm71_vm0, %v66_v11 }
  0xee   :  { %v4083_v12 = vpop.f32.mrf.mxu0 }
  0xef   :  { %203 = vst.msk [vmem:[#allocation2 + $0x8] sm:$0xff] %vm201_vm1, %v4083_v12 }
  0xf0   :  { %v162_v13 = vpop.f32.mrf.mxu0  ;;  %v4089_v14 = vpop.f32.mrf.mxu1 }
  0xf1   :  { %202 = vst.msk [vmem:[#allocation2] sm:$0xff] %vm201_vm1, %v162_v13  ;;  %207 = vst.msk [vmem:[#allocation2 + $0x28] sm:$0xff] %vm201_vm1, %v4089_v14 }
  0xf2   :  { %v4086_v15 = vpop.f32.mrf.mxu0  ;;  %v182_v16 = vpop.f32.mrf.mxu1 }
  0xf3   :  { %205 = vst.msk [vmem:[#allocation2 + $0x18] sm:$0xff] %vm201_vm1, %v4086_v15  ;;  %206 = vst.msk [vmem:[#allocation2 + $0x20] sm:$0xff] %vm201_vm1, %v182_v16 }
  0xf4   :  { %v172_v17 = vpop.f32.mrf.mxu0  ;;  %v4092_v18 = vpop.f32.mrf.mxu1 }
  0xf5   :  { %204 = vst.msk [vmem:[#allocation2 + $0x10] sm:$0xff] %vm201_vm1, %v172_v17  ;;  %209 = vst.msk [vmem:[#allocation2 + $0x38] sm:$0xff] %vm201_vm1, %v4092_v18 }
  0xf6   :  { %v4657_v19 = vld [vmem:[#allocation2 + $0x8] sm:$0xff]  ;;  %v192_v20 = vpop.f32.mrf.mxu1 }
  0xf7   :  { %229 = vrot.lane.b32.xlu0 %v4657_v19, %s4585_s0  ;;  %208 = vst.msk [vmem:[#allocation2 + $0x30] sm:$0xff] %vm201_vm1, %v192_v20 }
  0xf8   :  { %v4661_v21 = vld [vmem:[#allocation2] sm:$0xff]  ;;  %v4671_v24 = vld [vmem:[#allocation2 + $0x28] sm:$0xff] }
  0xf9   :  { %4097 = vmatprep.mubr.msk.f32.mxu1 %vm231_vm2, %v4661_v21 }
  0xfa   :  { %v4665_v22 = vld [vmem:[#allocation2 + $0x18] sm:$0xff]  ;;  %v4669_v23 = vld [vmem:[#allocation2 + $0x20] sm:$0xff] }
  0xfb   :  { %227 = vrot.lane.b32.xlu0 %v4661_v21, %s4585_s0  ;;  %319 = vrot.lane.b32.xlu1 %v4665_v22, %s4585_s0 }
  0xfc   :  { %v4673_v25 = vld [vmem:[#allocation2 + $0x10] sm:$0xff]  ;;  %4111 = vmatprep.mubr.msk.f32.mxu0 %vm231_vm2, %v4669_v23  ;;  %v4679_v26 = vld [vmem:[#allocation2 + $0x38] sm:$0xff] }
  0xfe   :  { %v4683_v27 = vld [vmem:[#allocation2 + $0x30] sm:$0xff] }
  0xff   :  { %408 = vrot.lane.b32.xlu0 %v4671_v24, %s4585_s0  ;;  %317 = vrot.lane.b32.xlu1 %v4673_v25, %s4585_s0 }
 0x103   :  { %497 = vrot.lane.b32.xlu0 %v4679_v26, %s4585_s0  ;;  %406 = vrot.lane.b32.xlu1 %v4669_v23, %s4585_s0 }
 0x107   :  { %667 = vrot.lane.b32.xlu0 %v4661_v21, %s4586_s2  ;;  %495 = vrot.lane.b32.xlu1 %v4683_v27, %s4585_s0 }
 0x10b   :  { %930 = vrot.lane.b32.xlu0 %v4679_v26, %s4586_s2  ;;  %669 = vrot.lane.b32.xlu1 %v4657_v19, %s4586_s2 }
 0x10f   :  { %1148 = vrot.lane.b32.xlu0 %v4665_v22, %s4587_s5  ;;  %756 = vrot.lane.b32.xlu1 %v4665_v22, %s4586_s2 }
 0x113   :  { %754 = vrot.lane.b32.xlu0 %v4673_v25, %s4586_s2  ;;  %843 = vrot.lane.b32.xlu1 %v4671_v24, %s4586_s2 }
 0x117   :  { %928 = vrot.lane.b32.xlu0 %v4683_v27, %s4586_s2  ;;  %841 = vrot.lane.b32.xlu1 %v4669_v23, %s4586_s2 }
 0x11b   :  { %1146 = vrot.lane.b32.xlu0 %v4673_v25, %s4587_s5  ;;  %1055 = vrot.lane.b32.xlu1 %v4657_v19, %s4587_s5 }
 0x11f   :  { %1053 = vrot.lane.b32.xlu1 %v4661_v21, %s4587_s5 }
 0x123   :  { %1049 = vrot.lane.b32.xlu1 %v4661_v21, %s4588_s6 }
 0x127   :  { %1241 = vrot.lane.b32.xlu1 %v4671_v24, %s4587_s5 }
 0x169   :  { %v230_v28 = vpop.permute.xlu0 %229 }
 0x16a   :  { %4093 = vmatprep.subr.msk.mxu1 %vm231_vm2, %v230_v28 }
 0x16b   :  { %4094 = vmatpush3.xpose.msk.msra.mxu1 %vm231_vm2, %v230_v28 }
 0x16d   :  { %v228_v29 = vpop.permute.xlu0 %227  ;;  %v320_v30 = vpop.permute.xlu1 %319 }
 0x16e   :  { %4095 = vmatprep.subr.msk.mxu1 %vm231_vm2, %v228_v29 }
 0x16f   :  { %4096 = vmatpush3.xpose.msk.msra.mxu1 %vm231_vm2, %v228_v29 }
 0x170   :  { %4100 = vmatprep.subr.msk.mxu1 %vm231_vm2, %v320_v30 }
 0x171   :  { %v409_v31 = vpop.permute.xlu0 %408  ;;  %v318_v32 = vpop.permute.xlu1 %317 }
 0x172   :  { %4098 = vmatmul.mubr.msk.f32.vlgmr.msra.gmra.mxu1 %vm231_vm2, %v4657_v19  ;;  %4107 = vmatprep.subr.msk.mxu0 %vm231_vm2, %v409_v31 }
 0x173   :  { %4101 = vmatpush3.xpose.msk.msra.mxu1 %vm231_vm2, %v320_v30  ;;  %4104 = vmatprep.mubr.msk.f32.mxu1 %vm231_vm2, %v4673_v25 }
 0x174   :  { %4108 = vmatpush3.xpose.msk.msra.mxu0 %vm231_vm2, %v409_v31  ;;  %4102 = vmatprep.subr.msk.mxu1 %vm231_vm2, %v318_v32 }
 0x175   :  { %v498_v33 = vpop.permute.xlu0 %497  ;;  %v407_v34 = vpop.permute.xlu1 %406 }
 0x176   :  { %4109 = vmatprep.subr.msk.mxu0 %vm231_vm2, %v407_v34 }
 0x177   :  { %4103 = vmatpush3.xpose.msk.msra.mxu1 %vm231_vm2, %v318_v32 }
 0x178   :  { %4110 = vmatpush3.xpose.msk.msra.mxu0 %vm231_vm2, %v407_v34  ;;  %4114 = vmatprep.subr.msk.mxu1 %vm231_vm2, %v498_v33 }
 0x179   :  { %v668_v35 = vpop.permute.xlu0 %667  ;;  %v496_v36 = vpop.permute.xlu1 %495 }
 0x17a   :  { %4105 = vmatmul.mubr.msk.f32.vlgmr.msra.gmra.mxu1 %vm231_vm2, %v4665_v22 }
 0x17b   :  { %4112 = vmatmul.mubr.msk.f32.vlgmr.msra.gmra.mxu0 %vm231_vm2, %v4671_v24  ;;  %4115 = vmatpush3.xpose.msk.msra.mxu1 %vm231_vm2, %v498_v33 }
 0x17c   :  { %4118 = vmatprep.mubr.msk.f32.mxu1 %vm231_vm2, %v4683_v27  ;;  %4116 = vmatprep.subr.msk.mxu1 %vm231_vm2, %v496_v36 }
 0x17d   :  { %v4731_v37 = vpop.permute.xlu0 %930  ;;  %v670_v38 = vpop.permute.xlu1 %669 }
 0x17e   :  { %4121 = vmatprep.subr.mxu0 %v670_v38 }
 0x17f   :  { %4117 = vmatpush3.xpose.msk.msra.mxu1 %vm231_vm2, %v496_v36  ;;  %4122 = vmatpush3.msra.mxu0 %v670_v38 }
 0x180   :  { %4123 = vmatprep.subr.mxu0 %v668_v35 }
 0x181   :  { %v4734_v39 = vpop.permute.xlu0 %1148  ;;  %4124 = vmatpush3.msra.mxu0 %v668_v35  ;;  %v757_v40 = vpop.permute.xlu1 %756 }
 0x182   :  { %4119 = vmatmul.mubr.msk.f32.vlgmr.msra.gmra.mxu1 %vm231_vm2, %v4679_v26  ;;  %4128 = vmatprep.subr.mxu1 %v757_v40 }
 0x183   :  { %4129 = vmatpush3.msra.mxu1 %v757_v40 }
 0x185   :  { %v755_v41 = vpop.permute.xlu0 %754  ;;  %v4738_v42 = vpop.permute.xlu1 %843 }
 0x186   :  { %4130 = vmatprep.subr.mxu1 %v755_v41  ;;  %4135 = vmatprep.subr.mxu0 %v4738_v42 }
 0x187   :  { %4131 = vmatpush3.msra.mxu1 %v755_v41 }
 0x188   :  { %4142 = vmatprep.subr.mxu1 %v4731_v37 }
 0x189   :  { %v842_v9 = vpop.permute.xlu1 %841  ;;  %v929_v13 = vpop.permute.xlu0 %928 }
 0x18d   :  { %v1056_v10 = vpop.permute.xlu1 %1055  ;;  %v4835_v15 = vpop.permute.xlu0 %1146 }
 0x191   :  { %v1054_v11 = vpop.permute.xlu1 %1053 }
 0x195   :  { %v1050_v12 = vpop.permute.xlu1 %1049 }
 0x199   :  { %v1242_v14 = vpop.permute.xlu1 %1241 }
 0x232   :  { %v4099_v48 = vpop.f32.mrf.mxu1 }
 0x233   :  { %v4748_v49 = vsel %vm4742_vm3, %v4099_v48, -1e+30 }
 0x234   :  { %v598_v50 = vsel %vm594_vm4, %v4748_v49, -inf  ;;  %v306_v51 = vpop.f32.mrf.mxu1 }
 0x235   :  { %599 = vmax.xlane.f32.xlu1 %v598_v50  ;;  %v586_v59 = vsel %vm4752_vm5, %v306_v51, -1e+30 }
 0x236   :  { %v595_v61 = vsel %vm594_vm4, %v586_v59, -inf }
 0x23a   :  { %v4106_v52 = vpop.f32.mrf.mxu1 }
 0x23b   :  { %v4758_v54 = vsel %vm4742_vm3, %v4106_v52, -1e+30  ;;  %v4113_v55 = vpop.f32.mrf.mxu0 }
 0x23c   :  { %v4762_v56 = vsel %vm4742_vm3, %v4113_v55, -1e+30  ;;  %v604_v57 = vsel %vm594_vm4, %v4758_v54, -inf  ;;  %v395_v63 = vpop.f32.mrf.mxu1 }
 0x23d   :  { %v610_v58 = vsel %vm594_vm4, %v4762_v56, -inf  ;;  %605 = vmax.xlane.f32.xlu1 %v604_v57  ;;  %v484_v60 = vpop.f32.mrf.mxu0  ;;  %v4779_v1 = vsel %vm4752_vm5, %v395_v63, -1e+30 }
 0x23e   :  { %611 = vmax.xlane.f32.xlu0 %v610_v58  ;;  %v4773_v62 = vsel %vm4752_vm5, %v484_v60, -1e+30  ;;  %v601_v3 = vsel %vm594_vm4, %v4779_v1, -inf }
 0x23f   :  { %v607_v0 = vsel %vm594_vm4, %v4773_v62, -inf }
 0x242   :  { %596 = vmax.xlane.f32.xlu0 %v595_v61  ;;  %v4120_v2 = vpop.f32.mrf.mxu1 }
 0x243   :  { %v4785_v4 = vsel %vm4742_vm3, %v4120_v2, -1e+30 }
 0x244   :  { %v616_v5 = vsel %vm594_vm4, %v4785_v4, -inf  ;;  %v573_v6 = vpop.f32.mrf.mxu1 }
 0x245   :  { %v4799_v7 = vsel %vm4752_vm5, %v573_v6, -1e+30 }
 0x246   :  { %608 = vmax.xlane.f32.xlu0 %v607_v0  ;;  %v613_v8 = vsel %vm594_vm4, %v4799_v7, -inf }
 0x24a   :  { %602 = vmax.xlane.f32.xlu0 %v601_v3 }
 0x24e   :  { %617 = vmax.xlane.f32.xlu0 %v616_v5  ;;  %1142 = vrot.lane.b32.xlu1 %v4673_v25, %s4588_s6 }
 0x264   :  { %1051 = vrot.lane.b32.xlu0 %v4657_v19, %s4588_s6 }
 0x268   :  { %1239 = vrot.lane.b32.xlu0 %v4669_v23, %s4587_s5 }
 0x26c   :  { %1144 = vrot.lane.b32.xlu0 %v4665_v22, %s4588_s6 }
 0x270   :  { %1237 = vrot.lane.b32.xlu0 %v4671_v24, %s4588_s6 }
 0x272   :  { %614 = vmax.xlane.f32.xlu1 %v613_v8 }
 0x274   :  { %1328 = vrot.lane.b32.xlu0 %v4683_v27, %s4588_s6 }
 0x278   :  { %1499 = vrot.lane.b32.xlu0 %v4661_v21, %s4589_s7 }
 0x27c   :  { %1586 = vrot.lane.b32.xlu0 %v4673_v25, %s4589_s7 }
 0x280   :  { %1762 = vrot.lane.b32.xlu0 %v4679_v26, %s4589_s7 }
 0x283   :  { %1334 = vrot.lane.b32.xlu1 %v4679_v26, %s4587_s5 }
 0x284   :  { %1760 = vrot.lane.b32.xlu0 %v4683_v27, %s4589_s7 }
 0x287   :  { %1235 = vrot.lane.b32.xlu1 %v4669_v23, %s4588_s6 }
 0x288   :  { %2013 = vrot.lane.b32.xlu0 %v4665_v22, %s4590_s8 }
 0x28b   :  { %1332 = vrot.lane.b32.xlu1 %v4683_v27, %s4587_s5 }
 0x28c   :  { %2011 = vrot.lane.b32.xlu0 %v4673_v25, %s4590_s8 }
 0x28f   :  { %1330 = vrot.lane.b32.xlu1 %v4679_v26, %s4588_s6 }
 0x293   :  { %1501 = vrot.lane.b32.xlu1 %v4657_v19, %s4589_s7 }
 0x297   :  { %1588 = vrot.lane.b32.xlu1 %v4665_v22, %s4589_s7 }
 0x29b   :  { %1675 = vrot.lane.b32.xlu1 %v4671_v24, %s4589_s7 }
 0x29f   :  { %1673 = vrot.lane.b32.xlu1 %v4669_v23, %s4589_s7 }
 0x2a3   :  { %1920 = vrot.lane.b32.xlu1 %v4657_v19, %s4590_s8 }
 0x2a7   :  { %1918 = vrot.lane.b32.xlu1 %v4661_v21, %s4590_s8 }
 0x2ab   :  { %1914 = vrot.lane.b32.xlu1 %v4661_v21, %s4591_s9 }
 0x2af   :  { %2106 = vrot.lane.b32.xlu1 %v4671_v24, %s4590_s8 }
 0x2be   :  { %v600_v16 = vpop.xlane.xlu1 %599 }
 0x2bf   :  { %v620_v18 = vsub.f32 %v4748_v49, %v600_v16 }
 0x2c1   :  { %v629_v29 = vmul.f32 1.442695, %v620_v18 }
 0x2c6   :  { %v606_v31 = vpop.xlane.xlu1 %605 }
 0x2c7   :  { %v612_v17 = vpop.xlane.xlu0 %611  ;;  %v622_v36 = vsub.f32 %v4758_v54, %v606_v31 }
 0x2c8   :  { %v624_v30 = vsub.f32 %v4762_v56, %v612_v17 }
 0x2c9   :  { %v633_v43 = vmul.f32 1.442695, %v622_v36 }
 0x2ca   :  { %v637_v35 = vmul.f32 1.442695, %v624_v30  ;;  %v1143_v55 = vpop.permute.xlu1 %1142 }
 0x2cb   :  { %v597_v20 = vpop.xlane.xlu0 %596 }
 0x2cc   :  { %v619_v28 = vsub.f32 %v586_v59, %v597_v20 }
 0x2ce   :  { %v627_v32 = vmul.f32 1.442695, %v619_v28 }
 0x2cf   :  { %v609_v33 = vpop.xlane.xlu0 %608 }
 0x2d0   :  { %4364 = vpow2.f32 %v627_v32  ;;  %v623_v34 = vsub.f32 %v4773_v62, %v609_v33 }
 0x2d1   :  { %4366 = vpow2.f32 %v629_v29 }
 0x2d2   :  { %v635_v38 = vmul.f32 1.442695, %v623_v34 }
 0x2d3   :  { %v603_v40 = vpop.xlane.xlu0 %602 }
 0x2d4   :  { %4368 = vpow2.f32 %v635_v38  ;;  %v621_v41 = vsub.f32 %v4779_v1, %v603_v40 }
 0x2d5   :  { %4370 = vpow2.f32 %v637_v35 }
 0x2d6   :  { %v631_v44 = vmul.f32 1.442695, %v621_v41 }
 0x2d7   :  { %v618_v48 = vpop.xlane.xlu0 %617 }
 0x2d8   :  { %4372 = vpow2.f32 %v631_v44 }
 0x2d9   :  { %4374 = vpow2.f32 %v633_v43 }
 0x2db   :  { %v1052_v52 = vpop.permute.xlu0 %1051 }
 0x2dd   :  { %v4842_v45 = vpop.eup %4364 }
 0x2de   :  { %v4844_v46 = vpop.eup %4366  ;;  %4125 = vmatprep.mubr.msk.f32.mxu0 %vm594_vm4, %v4842_v45 }
 0x2df   :  { %4126 = vmatmul.mubr.msk.f32.vlgmr.msra.gmra.mxu0 %vm594_vm4, %v4844_v46  ;;  %v1240_v54 = vpop.permute.xlu0 %1239 }
 0x2e0   :  { %4136 = vmatpush3.msra.mxu0 %v4738_v42 }
 0x2e1   :  { %v4851_v49 = vpop.eup %4368  ;;  %4137 = vmatprep.subr.mxu0 %v842_v9 }
 0x2e2   :  { %v4853_v50 = vpop.eup %4370  ;;  %4138 = vmatpush3.msra.mxu0 %v842_v9  ;;  %4139 = vmatprep.mubr.msk.f32.mxu0 %vm594_vm4, %v4851_v49 }
 0x2e3   :  { %4149 = vmatprep.subr.msk.mxu0 %vm231_vm2, %v1056_v10  ;;  %4140 = vmatmul.mubr.msk.f32.vlgmr.msra.gmra.mxu0 %vm594_vm4, %v4853_v50  ;;  %v1145_v59 = vpop.permute.xlu0 %1144 }
 0x2e4   :  { %4150 = vmatpush3.xpose.msk.msra.mxu0 %vm231_vm2, %v1056_v10  ;;  %4153 = vmatprep.mubr.msk.f32.mxu0 %vm231_vm2, %v1050_v12 }
 0x2e5   :  { %v4862_v51 = vpop.eup %4372  ;;  %4151 = vmatprep.subr.msk.mxu0 %vm231_vm2, %v1054_v11 }
 0x2e6   :  { %v4865_v42 = vpop.eup %4374  ;;  %4132 = vmatprep.mubr.msk.f32.mxu1 %vm594_vm4, %v4862_v51 }
 0x2e7   :  { %4133 = vmatmul.mubr.msk.f32.vlgmr.msra.gmra.mxu1 %vm594_vm4, %v4865_v42  ;;  %v1238_v63 = vpop.permute.xlu0 %1237 }
 0x2e8   :  { %4143 = vmatpush3.msra.mxu1 %v4731_v37  ;;  %4152 = vmatpush3.xpose.msk.msra.mxu0 %vm231_vm2, %v1054_v11  ;;  %v626_v37 = vsub.f32 %v4785_v4, %v618_v48 }
 0x2e9   :  { %4144 = vmatprep.subr.mxu1 %v929_v13  ;;  %4163 = vmatprep.subr.msk.mxu0 %vm231_vm2, %v1242_v14 }
 0x2ea   :  { %4145 = vmatpush3.msra.mxu1 %v929_v13  ;;  %v641_v58 = vmul.f32 1.442695, %v626_v37 }
 0x2eb   :  { %4154 = vmatmul.mubr.msk.f32.vlgmr.msra.gmra.mxu0 %vm231_vm2, %v1052_v52  ;;  %4156 = vmatprep.subr.msk.mxu1 %vm231_vm2, %v4734_v39  ;;  %v1329_v2 = vpop.permute.xlu0 %1328 }
 0x2ec   :  { %4164 = vmatpush3.xpose.msk.msra.mxu0 %vm231_vm2, %v1242_v14 }
 0x2ed   :  { %4165 = vmatprep.subr.msk.mxu0 %vm231_vm2, %v1240_v54 }
 0x2ef   :  { %v1500_v6 = vpop.permute.xlu0 %1499 }
 0x2f0   :  { %4166 = vmatpush3.xpose.msk.msra.mxu0 %vm231_vm2, %v1240_v54 }
 0x2fb   :  { %v615_v56 = vpop.xlane.xlu1 %614 }
 0x2fc   :  { %v625_v57 = vsub.f32 %v4799_v7, %v615_v56 }
 0x2fe   :  { %v639_v60 = vmul.f32 1.442695, %v625_v57 }
 0x2ff   :  { %v1335_v61 = vpop.permute.xlu1 %1334 }
 0x300   :  { %4376 = vpow2.f32 %v639_v60 }
 0x301   :  { %4378 = vpow2.f32 %v641_v58 }
 0x303   :  { %v1236_v62 = vpop.permute.xlu1 %1235 }
 0x304   :  { %4167 = vmatprep.mubr.msk.f32.mxu0 %vm231_vm2, %v1236_v62 }
 0x305   :  { %4168 = vmatmul.mubr.msk.f32.vlgmr.msra.gmra.mxu0 %vm231_vm2, %v1238_v63 }
 0x307   :  { %v1333_v0 = vpop.permute.xlu1 %1332 }
 0x30b   :  { %v1331_v1 = vpop.permute.xlu1 %1330 }
 0x30d   :  { %v4884_v3 = vpop.eup %4376 }
 0x30e   :  { %v4886_v4 = vpop.eup %4378  ;;  %4146 = vmatprep.mubr.msk.f32.mxu1 %vm594_vm4, %v4884_v3 }
 0x30f   :  { %4147 = vmatmul.mubr.msk.f32.vlgmr.msra.gmra.mxu1 %vm594_vm4, %v4886_v4  ;;  %v1502_v5 = vpop.permute.xlu1 %1501 }
 0x310   :  { %4157 = vmatpush3.xpose.msk.msra.mxu1 %vm231_vm2, %v4734_v39  ;;  %4160 = vmatprep.mubr.msk.f32.mxu1 %vm231_vm2, %v1143_v55  ;;  %v1587_v39 = vpop.permute.xlu0 %1586 }
 0x311   :  { %4158 = vmatprep.subr.msk.mxu1 %vm231_vm2, %v4835_v15  ;;  %4177 = vmatprep.subr.mxu0 %v1502_v5 }
 0x312   :  { %4178 = vmatpush3.msra.mxu0 %v1502_v5 }
 0x313   :  { %4179 = vmatprep.subr.mxu0 %v1500_v6  ;;  %v1589_v7 = vpop.permute.xlu1 %1588 }
 0x314   :  { %4159 = vmatpush3.xpose.msk.msra.mxu1 %vm231_vm2, %v4835_v15  ;;  %4180 = vmatpush3.msra.mxu0 %v1500_v6  ;;  %v4909_v9 = vpop.permute.xlu0 %1762 }
 0x315   :  { %4170 = vmatprep.subr.msk.mxu1 %vm231_vm2, %v1335_v61 }
 0x317   :  { %4161 = vmatmul.mubr.msk.f32.vlgmr.msra.gmra.mxu1 %vm231_vm2, %v1145_v59  ;;  %v4901_v8 = vpop.permute.xlu1 %1675 }
 0x318   :  { %4171 = vmatpush3.xpose.msk.msra.mxu1 %vm231_vm2, %v1335_v61  ;;  %4174 = vmatprep.mubr.msk.f32.mxu1 %vm231_vm2, %v1329_v2  ;;  %v5006_v62 = vpop.permute.xlu0 %1760 }
 0x319   :  { %4172 = vmatprep.subr.msk.mxu1 %vm231_vm2, %v1333_v0  ;;  %4191 = vmatprep.subr.mxu0 %v4901_v8 }
 0x31b   :  { %v1674_v59 = vpop.permute.xlu1 %1673 }
 0x31c   :  { %4173 = vmatpush3.xpose.msk.msra.mxu1 %vm231_vm2, %v1333_v0  ;;  %v5010_v0 = vpop.permute.xlu0 %2013 }
 0x31d   :  { %4184 = vmatprep.subr.mxu1 %v1589_v7 }
 0x31f   :  { %4175 = vmatmul.mubr.msk.f32.vlgmr.msra.gmra.mxu1 %vm231_vm2, %v1331_v1  ;;  %v1921_v60 = vpop.permute.xlu1 %1920 }
 0x320   :  { %4185 = vmatpush3.msra.mxu1 %v1589_v7  ;;  %v5016_v2 = vpop.permute.xlu0 %2011 }
 0x321   :  { %4186 = vmatprep.subr.mxu1 %v1587_v39 }
 0x322   :  { %4187 = vmatpush3.msra.mxu1 %v1587_v39 }
 0x323   :  { %4198 = vmatprep.subr.mxu1 %v4909_v9  ;;  %v1919_v61 = vpop.permute.xlu1 %1918 }
 0x327   :  { %v1915_v63 = vpop.permute.xlu1 %1914 }
 0x32b   :  { %v2107_v1 = vpop.permute.xlu1 %2106 }
 0x39f   :  { %v4912_v10 = vpop.f32.mrf.mxu0 }
 0x3a1   :  { %v4914_v11 = vpop.f32.mrf.mxu0 }
 0x3a3   :  { %v4916_v12 = vpop.f32.mrf.mxu0 }
 0x3a5   :  { %v4918_v13 = vpop.f32.mrf.mxu0 }
 0x3a7   :  { %v4942_v33 = vpop.f32.mrf.mxu1 }
 0x3a9   :  { %v4946_v35 = vpop.f32.mrf.mxu1 }
 0x3ab   :  { %v4155_v14 = vpop.f32.mrf.mxu0 }
 0x3ac   :  { %v4922_v15 = vsel %vm4742_vm3, %v4155_v14, -1e+30 }
 0x3ad   :  { %v1131_v16 = vpop.f32.mrf.mxu0  ;;  %v1430_v17 = vsel %vm594_vm4, %v4922_v15, -inf }
 0x3ae   :  { %v4928_v18 = vsel %vm4752_vm5, %v1131_v16, -1e+30  ;;  %1431 = vmax.xlane.f32.xlu1 %v1430_v17 }
 0x3af   :  { %v1427_v20 = vsel %vm594_vm4, %v4928_v18, -inf }
 0x3b0   :  { %1428 = vmax.xlane.f32.xlu0 %v1427_v20 }
 0x3c5   :  { %v4169_v28 = vpop.f32.mrf.mxu0 }
 0x3c6   :  { %v4934_v29 = vsel %vm4742_vm3, %v4169_v28, -1e+30 }
 0x3c7   :  { %v1317_v30 = vpop.f32.mrf.mxu0  ;;  %v1442_v31 = vsel %vm594_vm4, %v4934_v29, -inf }
 0x3c8   :  { %v4940_v32 = vsel %vm4752_vm5, %v1317_v30, -1e+30  ;;  %1443 = vmax.xlane.f32.xlu0 %v1442_v31 }
 0x3c9   :  { %v1439_v34 = vsel %vm594_vm4, %v4940_v32, -inf }
 0x3cc   :  { %1440 = vmax.xlane.f32.xlu0 %v1439_v34 }
 0x3cf   :  { %v4948_v36 = vpop.f32.mrf.mxu1 }
 0x3d0   :  { %5540 = vst [vmem:[#allocation14_spill] sm:$0xff] %v4948_v36 }
 0x3d1   :  { %v4950_v38 = vpop.f32.mrf.mxu1 }
 0x3d7   :  { %v4162_v40 = vpop.f32.mrf.mxu1 }
 0x3d8   :  { %v4954_v41 = vsel %vm4742_vm3, %v4162_v40, -1e+30 }
 0x3d9   :  { %v1224_v43 = vpop.f32.mrf.mxu1  ;;  %v1436_v44 = vsel %vm594_vm4, %v4954_v41, -inf }
 0x3da   :  { %v4960_v48 = vsel %vm4752_vm5, %v1224_v43, -1e+30  ;;  %1437 = vmax.xlane.f32.xlu1 %v1436_v44 }
 0x3db   :  { %v1433_v52 = vsel %vm594_vm4, %v4960_v48, -inf }
 0x3dc   :  { %1434 = vmax.xlane.f32.xlu0 %v1433_v52 }
 0x3df   :  { %v4176_v54 = vpop.f32.mrf.mxu1 }
 0x3e0   :  { %v4966_v55 = vsel %vm4742_vm3, %v4176_v54, -1e+30 }
 0x3e1   :  { %v1448_v37 = vsel %vm594_vm4, %v4966_v55, -inf  ;;  %v1410_v56 = vpop.f32.mrf.mxu1 }
 0x3e2   :  { %1449 = vmax.xlane.f32.xlu0 %v1448_v37  ;;  %v4984_v57 = vsel %vm4752_vm5, %v1410_v56, -1e+30 }
 0x3e3   :  { %v1445_v58 = vsel %vm594_vm4, %v4984_v57, -inf }
 0x3eb   :  { %2007 = vrot.lane.b32.xlu1 %v4673_v25, %s4591_s9 }
 0x3f8   :  { %1916 = vrot.lane.b32.xlu0 %v4657_v19, %s4591_s9 }
 0x3fc   :  { %2104 = vrot.lane.b32.xlu0 %v4669_v23, %s4590_s8 }
 0x400   :  { %2009 = vrot.lane.b32.xlu0 %v4665_v22, %s4591_s9 }
 0x404   :  { %2102 = vrot.lane.b32.xlu0 %v4671_v24, %s4591_s9 }
 0x408   :  { %2193 = vrot.lane.b32.xlu0 %v4683_v27, %s4591_s9 }
 0x40c   :  { %2364 = vrot.lane.b32.xlu0 %v4661_v21, %s4592_s10 }
 0x40f   :  { %1446 = vmax.xlane.f32.xlu1 %v1445_v58 }
 0x410   :  { %2451 = vrot.lane.b32.xlu0 %v4673_v25, %s4592_s10 }
 0x414   :  { %2627 = vrot.lane.b32.xlu0 %v4679_v26, %s4592_s10 }
 0x418   :  { %2625 = vrot.lane.b32.xlu0 %v4683_v27, %s4592_s10 }
 0x41c   :  { %2878 = vrot.lane.b32.xlu0 %v4665_v22, %s4593_s11 }
 0x420   :  { %2781 = vrot.lane.b32.xlu0 %v4657_v19, %s4594_s12  ;;  %2199 = vrot.lane.b32.xlu1 %v4679_v26, %s4590_s8 }
 0x424   :  { %2100 = vrot.lane.b32.xlu1 %v4669_v23, %s4591_s9 }
 0x428   :  { %2197 = vrot.lane.b32.xlu1 %v4683_v27, %s4590_s8 }
 0x42c   :  { %2195 = vrot.lane.b32.xlu1 %v4679_v26, %s4591_s9 }
 0x430   :  { %2366 = vrot.lane.b32.xlu1 %v4657_v19, %s4592_s10 }
 0x434   :  { %2453 = vrot.lane.b32.xlu1 %v4665_v22, %s4592_s10 }
 0x437   :  { %v1432_v5 = vpop.xlane.xlu1 %1431 }
 0x438   :  { %v1452_v6 = vsub.f32 %v4922_v15, %v1432_v5  ;;  %2540 = vrot.lane.b32.xlu1 %v4671_v24, %s4592_s10 }
 0x439   :  { %v1429_v7 = vpop.xlane.xlu0 %1428 }
 0x43a   :  { %v1451_v39 = vsub.f32 %v4928_v18, %v1429_v7  ;;  %v1461_v14 = vmul.f32 1.442695, %v1452_v6 }
 0x43c   :  { %v1459_v16 = vmul.f32 1.442695, %v1451_v39  ;;  %2538 = vrot.lane.b32.xlu1 %v4669_v23, %s4592_s10 }
 0x43e   :  { %4380 = vpow2.f32 %v1459_v16 }
 0x43f   :  { %4382 = vpow2.f32 %v1461_v14 }
 0x440   :  { %2785 = vrot.lane.b32.xlu1 %v4657_v19, %s4593_s11 }
 0x444   :  { %2783 = vrot.lane.b32.xlu1 %v4661_v21, %s4593_s11 }
 0x448   :  { %2779 = vrot.lane.b32.xlu1 %v4661_v21, %s4594_s12 }
 0x44b   :  { %v5030_v15 = vpop.eup %4380 }
 0x44c   :  { %v5032_v17 = vpop.eup %4382  ;;  %4181 = vmatprep.mubr.msk.f32.mxu0 %vm594_vm4, %v5030_v15  ;;  %2876 = vrot.lane.b32.xlu1 %v4673_v25, %s4593_s11  ;;  %v1475_v47 = vsel %vm594_vm4, %v5030_v15, 0.0 }
 0x44d   :  { %4182 = vmatmul.mubr.msk.f32.vlgmr.msra.gmra.mxu0 %vm594_vm4, %v5032_v17  ;;  %v1478_v53 = vsel %vm594_vm4, %v5032_v17, 0.0 }
 0x44e   :  { %4192 = vmatpush3.msra.mxu0 %v4901_v8 }
 0x44f   :  { %4193 = vmatprep.subr.mxu0 %v1674_v59 }
 0x450   :  { %4194 = vmatpush3.msra.mxu0 %v1674_v59 }
 0x451   :  { %4205 = vmatprep.subr.msk.mxu0 %vm231_vm2, %v1921_v60  ;;  %v1444_v18 = vpop.xlane.xlu0 %1443 }
 0x452   :  { %v1456_v20 = vsub.f32 %v4934_v29, %v1444_v18 }
 0x454   :  { %v1469_v31 = vmul.f32 1.442695, %v1456_v20 }
 0x455   :  { %v1441_v28 = vpop.xlane.xlu0 %1440 }
 0x456   :  { %v1455_v30 = vsub.f32 %v4940_v32, %v1441_v28 }
 0x458   :  { %v1467_v34 = vmul.f32 1.442695, %v1455_v30 }
 0x45a   :  { %4384 = vpow2.f32 %v1467_v34 }
 0x45b   :  { %4386 = vpow2.f32 %v1469_v31 }
 0x463   :  { %v1438_v40 = vpop.xlane.xlu1 %1437 }
 0x464   :  { %v1454_v43 = vsub.f32 %v4954_v41, %v1438_v40 }
 0x465   :  { %v1435_v44 = vpop.xlane.xlu0 %1434 }
 0x466   :  { %v1453_v8 = vsub.f32 %v4960_v48, %v1435_v44  ;;  %v1465_v54 = vmul.f32 1.442695, %v1454_v43 }
 0x467   :  { %v5046_v52 = vpop.eup %4384  ;;  %v2008_v59 = vpop.permute.xlu1 %2007 }
 0x468   :  { %v5048_v37 = vpop.eup %4386  ;;  %v1463_v56 = vmul.f32 1.442695, %v1453_v8  ;;  %4195 = vmatprep.mubr.msk.f32.mxu0 %vm594_vm4, %v5046_v52 }
 0x469   :  { %4196 = vmatmul.mubr.msk.f32.vlgmr.msra.gmra.mxu0 %vm594_vm4, %v5048_v37 }
 0x46a   :  { %4388 = vpow2.f32 %v1463_v56  ;;  %4206 = vmatpush3.xpose.msk.msra.mxu0 %vm231_vm2, %v1921_v60  ;;  %4209 = vmatprep.mubr.msk.f32.mxu0 %vm231_vm2, %v1915_v63 }
 0x46b   :  { %4390 = vpow2.f32 %v1465_v54  ;;  %v1450_v29 = vpop.xlane.xlu0 %1449  ;;  %4207 = vmatprep.subr.msk.mxu0 %vm231_vm2, %v1919_v61 }
 0x46c   :  { %v1458_v60 = vsub.f32 %v4966_v55, %v1450_v29 }
 0x46e   :  { %4208 = vmatpush3.xpose.msk.msra.mxu0 %vm231_vm2, %v1919_v61 }
 0x46f   :  { %v1917_v32 = vpop.permute.xlu0 %1916  ;;  %4219 = vmatprep.subr.msk.mxu0 %vm231_vm2, %v2107_v1 }
 0x471   :  { %4210 = vmatmul.mubr.msk.f32.vlgmr.msra.gmra.mxu0 %vm231_vm2, %v1917_v32 }
 0x472   :  { %4220 = vmatpush3.xpose.msk.msra.mxu0 %vm231_vm2, %v2107_v1  ;;  %v1473_v1 = vmul.f32 1.442695, %v1458_v60 }
 0x473   :  { %v2105_v41 = vpop.permute.xlu0 %2104 }
 0x474   :  { %4221 = vmatprep.subr.msk.mxu0 %vm231_vm2, %v2105_v41 }
 0x476   :  { %4222 = vmatpush3.xpose.msk.msra.mxu0 %vm231_vm2, %v2105_v41 }
 0x477   :  { %v5063_v48 = vpop.eup %4388  ;;  %v2010_v5 = vpop.permute.xlu0 %2009 }
 0x478   :  { %v5065_v58 = vpop.eup %4390  ;;  %4188 = vmatprep.mubr.msk.f32.mxu1 %vm594_vm4, %v5063_v48 }
 0x479   :  { %4189 = vmatmul.mubr.msk.f32.vlgmr.msra.gmra.mxu1 %vm594_vm4, %v5065_v58 }
 0x47a   :  { %4199 = vmatpush3.msra.mxu1 %v4909_v9 }
 0x47b   :  { %4200 = vmatprep.subr.mxu1 %v5006_v62  ;;  %v2103_v39 = vpop.permute.xlu0 %2102 }
 0x47c   :  { %4201 = vmatpush3.msra.mxu1 %v5006_v62 }
 0x47d   :  { %4212 = vmatprep.subr.msk.mxu1 %vm231_vm2, %v5010_v0 }
 0x47f   :  { %v2194_v16 = vpop.permute.xlu0 %2193 }
 0x483   :  { %v2365_v20 = vpop.permute.xlu0 %2364 }
 0x498   :  { %v1447_v61 = vpop.xlane.xlu1 %1446 }
 0x499   :  { %v1457_v63 = vsub.f32 %v4984_v57, %v1447_v61 }
 0x49b   :  { %v1471_v6 = vmul.f32 1.442695, %v1457_v63 }
 0x49c   :  { %v2200_v7 = vpop.permute.xlu1 %2199 }
 0x49d   :  { %4392 = vpow2.f32 %v1471_v6 }
 0x49e   :  { %4394 = vpow2.f32 %v1473_v1 }
 0x4a0   :  { %v2101_v9 = vpop.permute.xlu1 %2100 }
 0x4a1   :  { %4223 = vmatprep.mubr.msk.f32.mxu0 %vm231_vm2, %v2101_v9 }
 0x4a2   :  { %4224 = vmatmul.mubr.msk.f32.vlgmr.msra.gmra.mxu0 %vm231_vm2, %v2103_v39 }
 0x4a4   :  { %v2198_v62 = vpop.permute.xlu1 %2197 }
 0x4a8   :  { %v2196_v14 = vpop.permute.xlu1 %2195 }
 0x4aa   :  { %v5080_v18 = vpop.eup %4392 }
 0x4ab   :  { %v5082_v55 = vpop.eup %4394  ;;  %4202 = vmatprep.mubr.msk.f32.mxu1 %vm594_vm4, %v5080_v18 }
 0x4ac   :  { %4203 = vmatmul.mubr.msk.f32.vlgmr.msra.gmra.mxu1 %vm594_vm4, %v5082_v55  ;;  %v2367_v57 = vpop.permute.xlu1 %2366 }
 0x4ad   :  { %4213 = vmatpush3.xpose.msk.msra.mxu1 %vm231_vm2, %v5010_v0  ;;  %4216 = vmatprep.mubr.msk.f32.mxu1 %vm231_vm2, %v2008_v59  ;;  %v2452_v0 = vpop.permute.xlu0 %2451 }
 0x4ae   :  { %4214 = vmatprep.subr.msk.mxu1 %vm231_vm2, %v5016_v2  ;;  %4233 = vmatprep.subr.mxu0 %v2367_v57 }
 0x4af   :  { %4234 = vmatpush3.msra.mxu0 %v2367_v57 }
 0x4b0   :  { %4235 = vmatprep.subr.mxu0 %v2365_v20  ;;  %v2454_v28 = vpop.permute.xlu1 %2453 }
 0x4b1   :  { %4215 = vmatpush3.xpose.msk.msra.mxu1 %vm231_vm2, %v5016_v2  ;;  %4236 = vmatpush3.msra.mxu0 %v2365_v20  ;;  %v5105_v2 = vpop.permute.xlu0 %2627 }
 0x4b2   :  { %4226 = vmatprep.subr.msk.mxu1 %vm231_vm2, %v2200_v7 }
 0x4b4   :  { %4217 = vmatmul.mubr.msk.f32.vlgmr.msra.gmra.mxu1 %vm231_vm2, %v2010_v5  ;;  %v5097_v30 = vpop.permute.xlu1 %2540 }
 0x4b5   :  { %4227 = vmatpush3.xpose.msk.msra.mxu1 %vm231_vm2, %v2200_v7  ;;  %4230 = vmatprep.mubr.msk.f32.mxu1 %vm231_vm2, %v2194_v16 }
 0x4b6   :  { %4228 = vmatprep.subr.msk.mxu1 %vm231_vm2, %v2198_v62  ;;  %4247 = vmatprep.subr.mxu0 %v5097_v30 }
 0x4b9   :  { %4229 = vmatpush3.xpose.msk.msra.mxu1 %vm231_vm2, %v2198_v62 }
 0x4ba   :  { %4240 = vmatprep.subr.mxu1 %v2454_v28 }
 0x4bc   :  { %4231 = vmatmul.mubr.msk.f32.vlgmr.msra.gmra.mxu1 %vm231_vm2, %v2196_v14 }
 0x4bd   :  { %4241 = vmatpush3.msra.mxu1 %v2454_v28 }
 0x4be   :  { %4242 = vmatprep.subr.mxu1 %v2452_v0 }
 0x4bf   :  { %4243 = vmatpush3.msra.mxu1 %v2452_v0 }
 0x4c0   :  { %4254 = vmatprep.subr.mxu1 %v5105_v2 }
 0x50d   :  { %v5108_v31 = vpop.f32.mrf.mxu0 }
 0x50f   :  { %v5110_v34 = vpop.f32.mrf.mxu0 }
 0x529   :  { %v5112_v40 = vpop.f32.mrf.mxu0 }
 0x52b   :  { %v5114_v43 = vpop.f32.mrf.mxu0 }
 0x531   :  { %v4211_v44 = vpop.f32.mrf.mxu0 }
 0x532   :  { %v2285_v8 = vsel %vm4742_vm3, %v4211_v44, -1e+30 }
 0x533   :  { %v1996_v54 = vpop.f32.mrf.mxu0  ;;  %v2295_v56 = vsel %vm594_vm4, %v2285_v8, -inf }
 0x534   :  { %v2284_v29 = vsel %vm4752_vm5, %v1996_v54, -1e+30  ;;  %2296 = vmax.xlane.f32.xlu1 %v2295_v56  ;;  %v2539_v54 = vpop.permute.xlu1 %2538 }
 0x535   :  { %v2292_v32 = vsel %vm594_vm4, %v2284_v29, -inf }
 0x536   :  { %2293 = vmax.xlane.f32.xlu0 %v2292_v32 }
 0x538   :  { %v2786_v32 = vpop.permute.xlu1 %2785 }
 0x539   :  { %v5132_v1 = vpop.f32.mrf.mxu1 }
 0x53b   :  { %v5136_v6 = vpop.f32.mrf.mxu1 }
 0x562   :  { %v4225_v41 = vpop.f32.mrf.mxu0 }
 0x563   :  { %v5124_v59 = vsel %vm4742_vm3, %v4225_v41, -1e+30 }
 0x564   :  { %v2182_v60 = vpop.f32.mrf.mxu0  ;;  %v2307_v61 = vsel %vm594_vm4, %v5124_v59, -inf }
 0x565   :  { %v5130_v63 = vsel %vm4752_vm5, %v2182_v60, -1e+30  ;;  %2308 = vmax.xlane.f32.xlu0 %v2307_v61  ;;  %v2784_v61 = vpop.permute.xlu1 %2783 }
 0x566   :  { %v2304_v5 = vsel %vm594_vm4, %v5130_v63, -inf }
 0x569   :  { %2305 = vmax.xlane.f32.xlu0 %v2304_v5  ;;  %v5182_v5 = vpop.permute.xlu0 %2625 }
 0x56c   :  { %v5138_v7 = vpop.f32.mrf.mxu1 }
 0x56e   :  { %v5140_v9 = vpop.f32.mrf.mxu1 }
 0x574   :  { %v4218_v39 = vpop.f32.mrf.mxu1 }
 0x575   :  { %v5144_v62 = vsel %vm4742_vm3, %v4218_v39, -1e+30  ;;  %v2780_v39 = vpop.permute.xlu1 %2779 }
 0x576   :  { %v2089_v14 = vpop.f32.mrf.mxu1  ;;  %v2301_v16 = vsel %vm594_vm4, %v5144_v62, -inf }
 0x577   :  { %v5150_v57 = vsel %vm4752_vm5, %v2089_v14, -1e+30  ;;  %2302 = vmax.xlane.f32.xlu1 %v2301_v16  ;;  %v5184_v14 = vpop.permute.xlu0 %2878 }
 0x578   :  { %v2298_v20 = vsel %vm594_vm4, %v5150_v57, -inf }
 0x579   :  { %2299 = vmax.xlane.f32.xlu0 %v2298_v20  ;;  %v5186_v16 = vpop.permute.xlu1 %2876 }
 0x57b   :  { %v2782_v20 = vpop.permute.xlu0 %2781 }
 0x57c   :  { %v4232_v28 = vpop.f32.mrf.mxu1 }
 0x57d   :  { %v5156_v0 = vsel %vm4742_vm3, %v4232_v28, -1e+30 }
 0x57e   :  { %v2313_v44 = vsel %vm594_vm4, %v5156_v0, -inf  ;;  %v2275_v56 = vpop.f32.mrf.mxu1 }
 0x57f   :  { %2314 = vmax.xlane.f32.xlu0 %v2313_v44  ;;  %v5174_v41 = vsel %vm4752_vm5, %v2275_v56, -1e+30 }
 0x580   :  { %v2310_v60 = vsel %vm594_vm4, %v5174_v41, -inf }
 0x588   :  { %2872 = vrot.lane.b32.xlu1 %v4673_v25, %s4594_s12 }
 0x595   :  { %2971 = vrot.lane.b32.xlu0 %v4671_v24, %s4593_s11 }
 0x599   :  { %2874 = vrot.lane.b32.xlu0 %v4665_v22, %s4594_s12 }
 0x59d   :  { %3064 = vrot.lane.b32.xlu0 %v4679_v26, %s4593_s11 }
 0x5a1   :  { %2967 = vrot.lane.b32.xlu0 %v4671_v24, %s4594_s12 }
 0x5a5   :  { %3058 = vrot.lane.b32.xlu0 %v4683_v27, %s4594_s12 }
 0x5a9   :  { %3229 = vrot.lane.b32.xlu0 %v4661_v21, %s4595_s13 }
 0x5ac   :  { %2311 = vmax.xlane.f32.xlu1 %v2310_v60 }
 0x5ad   :  { %3405 = vrot.lane.b32.xlu0 %v4671_v24, %s4595_s13 }
 0x5bd   :  { %2969 = vrot.lane.b32.xlu1 %v4669_v23, %s4593_s11  ;;  %v2297_v21 = vpop.xlane.xlu1 %2296 }
 0x5be   :  { %v2317_v28 = vsub.f32 %v2285_v8, %v2297_v21 }
 0x5bf   :  { %v2294_v44 = vpop.xlane.xlu0 %2293 }
 0x5c0   :  { %v2316_v56 = vsub.f32 %v2284_v29, %v2294_v44  ;;  %v2326_v60 = vmul.f32 1.442695, %v2317_v28 }
 0x5c1   :  { %2965 = vrot.lane.b32.xlu1 %v4669_v23, %s4594_s12 }
 0x5c2   :  { %v2324_v24 = vmul.f32 1.442695, %v2316_v56 }
 0x5c4   :  { %4396 = vpow2.f32 %v2324_v24 }
 0x5c5   :  { %4398 = vpow2.f32 %v2326_v60  ;;  %3062 = vrot.lane.b32.xlu1 %v4683_v27, %s4593_s11 }
 0x5c9   :  { %3060 = vrot.lane.b32.xlu1 %v4679_v26, %s4594_s12 }
 0x5cd   :  { %3231 = vrot.lane.b32.xlu1 %v4657_v19, %s4595_s13 }
 0x5d1   :  { %v5198_v36 = vpop.eup %4396  ;;  %3318 = vrot.lane.b32.xlu1 %v4665_v22, %s4595_s13 }
 0x5d2   :  { %v5202_v8 = vpop.eup %4398  ;;  %4237 = vmatprep.mubr.msk.f32.mxu0 %vm594_vm4, %v5198_v36 }
 0x5d3   :  { %4238 = vmatmul.mubr.msk.f32.vlgmr.msra.gmra.mxu0 %vm594_vm4, %v5202_v8 }
 0x5d4   :  { %4248 = vmatpush3.msra.mxu0 %v5097_v30 }
 0x5d5   :  { %3316 = vrot.lane.b32.xlu1 %v4673_v25, %s4595_s13  ;;  %4249 = vmatprep.subr.mxu0 %v2539_v54 }
 0x5d6   :  { %4250 = vmatpush3.msra.mxu0 %v2539_v54 }
 0x5d7   :  { %4261 = vmatprep.subr.msk.mxu0 %vm231_vm2, %v2786_v32 }
 0x5d9   :  { %3403 = vrot.lane.b32.xlu1 %v4669_v23, %s4595_s13 }
 0x5ee   :  { %v2309_v19 = vpop.xlane.xlu0 %2308 }
 0x5ef   :  { %v2321_v22 = vsub.f32 %v5124_v59, %v2309_v19 }
 0x5f1   :  { %v2334_v29 = vmul.f32 1.442695, %v2321_v22 }
 0x5f2   :  { %v2306_v26 = vpop.xlane.xlu0 %2305 }
 0x5f3   :  { %v2320_v27 = vsub.f32 %v5130_v63, %v2306_v26 }
 0x5f5   :  { %v2332_v21 = vmul.f32 1.442695, %v2320_v27 }
 0x5f7   :  { %4400 = vpow2.f32 %v2332_v21 }
 0x5f8   :  { %4402 = vpow2.f32 %v2334_v29 }
 0x600   :  { %v2303_v30 = vpop.xlane.xlu1 %2302 }
 0x601   :  { %v2319_v25 = vsub.f32 %v5144_v62, %v2303_v30 }
 0x602   :  { %v2300_v28 = vpop.xlane.xlu0 %2299 }
 0x603   :  { %v2318_v54 = vsub.f32 %v5150_v57, %v2300_v28  ;;  %v2330_v56 = vmul.f32 1.442695, %v2319_v25 }
 0x604   :  { %v5218_v44 = vpop.eup %4400 }
 0x605   :  { %v5220_v23 = vpop.eup %4402  ;;  %v2328_v60 = vmul.f32 1.442695, %v2318_v54  ;;  %4251 = vmatprep.mubr.msk.f32.mxu0 %vm594_vm4, %v5218_v44 }
 0x606   :  { %4252 = vmatmul.mubr.msk.f32.vlgmr.msra.gmra.mxu0 %vm594_vm4, %v5220_v23 }
 0x607   :  { %4404 = vpow2.f32 %v2328_v60  ;;  %4262 = vmatpush3.xpose.msk.msra.mxu0 %vm231_vm2, %v2786_v32  ;;  %4265 = vmatprep.mubr.msk.f32.mxu0 %vm231_vm2, %v2780_v39 }
 0x608   :  { %4406 = vpow2.f32 %v2330_v56  ;;  %v2315_v59 = vpop.xlane.xlu0 %2314  ;;  %4263 = vmatprep.subr.msk.mxu0 %vm231_vm2, %v2784_v61 }
 0x609   :  { %v2323_v39 = vsub.f32 %v5156_v0, %v2315_v59 }
 0x60b   :  { %4264 = vmatpush3.xpose.msk.msra.mxu0 %vm231_vm2, %v2784_v61  ;;  %v2873_v61 = vpop.permute.xlu1 %2872  ;;  %v2338_v22 = vmul.f32 1.442695, %v2323_v39 }
 0x60c   :  { %v2972_v63 = vpop.permute.xlu0 %2971 }
 0x60d   :  { %4275 = vmatprep.subr.msk.mxu0 %vm231_vm2, %v2972_v63 }
 0x60e   :  { %4266 = vmatmul.mubr.msk.f32.vlgmr.msra.gmra.mxu0 %vm231_vm2, %v2782_v20 }
 0x60f   :  { %4276 = vmatpush3.xpose.msk.msra.mxu0 %vm231_vm2, %v2972_v63 }
 0x610   :  { %v2875_v32 = vpop.permute.xlu0 %2874 }
 0x614   :  { %v5233_v62 = vpop.eup %4404  ;;  %v3065_v24 = vpop.permute.xlu0 %3064 }
 0x615   :  { %v5235_v57 = vpop.eup %4406  ;;  %4244 = vmatprep.mubr.msk.f32.mxu1 %vm594_vm4, %v5233_v62  ;;  %v2346_v15 = vsel %vm594_vm4, %v5233_v62, 0.0  ;;  %v2352_v62 = vsel %vm594_vm4, %v5218_v44, 0.0  ;;  %v1496_v44 = vsel %vm594_vm4, %v5082_v55, 0.0 }
 0x616   :  { %4245 = vmatmul.mubr.msk.f32.vlgmr.msra.gmra.mxu1 %vm594_vm4, %v5235_v57 }
 0x617   :  { %4255 = vmatpush3.msra.mxu1 %v5105_v2 }
 0x618   :  { %4256 = vmatprep.subr.mxu1 %v5182_v5  ;;  %v2968_v2 = vpop.permute.xlu0 %2967 }
 0x619   :  { %4257 = vmatpush3.msra.mxu1 %v5182_v5 }
 0x61a   :  { %4268 = vmatprep.subr.msk.mxu1 %vm231_vm2, %v5184_v14 }
 0x61c   :  { %v3059_v29 = vpop.permute.xlu0 %3058 }
 0x620   :  { %v3230_v25 = vpop.permute.xlu0 %3229 }
 0x624   :  { %v5265_v54 = vpop.permute.xlu0 %3405 }
 0x635   :  { %v2312_v20 = vpop.xlane.xlu1 %2311 }
 0x636   :  { %v2322_v19 = vsub.f32 %v5174_v41, %v2312_v20 }
 0x638   :  { %v2336_v26 = vmul.f32 1.442695, %v2322_v19 }
 0x639   :  { %v2970_v27 = vpop.permute.xlu1 %2969 }
 0x63a   :  { %4408 = vpow2.f32 %v2336_v26  ;;  %4277 = vmatprep.subr.msk.mxu0 %vm231_vm2, %v2970_v27 }
 0x63b   :  { %4410 = vpow2.f32 %v2338_v22  ;;  %4278 = vmatpush3.xpose.msk.msra.mxu0 %vm231_vm2, %v2970_v27 }
 0x63d   :  { %v2966_v5 = vpop.permute.xlu1 %2965 }
 0x63e   :  { %4279 = vmatprep.mubr.msk.f32.mxu0 %vm231_vm2, %v2966_v5 }
 0x63f   :  { %4280 = vmatmul.mubr.msk.f32.vlgmr.msra.gmra.mxu0 %vm231_vm2, %v2968_v2 }
 0x641   :  { %v3063_v0 = vpop.permute.xlu1 %3062 }
 0x645   :  { %v3061_v21 = vpop.permute.xlu1 %3060 }
 0x647   :  { %v5252_v30 = vpop.eup %4408 }
 0x648   :  { %v5254_v41 = vpop.eup %4410  ;;  %4258 = vmatprep.mubr.msk.f32.mxu1 %vm594_vm4, %v5252_v30 }
 0x649   :  { %4259 = vmatmul.mubr.msk.f32.vlgmr.msra.gmra.mxu1 %vm594_vm4, %v5254_v41  ;;  %v3232_v28 = vpop.permute.xlu1 %3231 }
 0x64a   :  { %4269 = vmatpush3.xpose.msk.msra.mxu1 %vm231_vm2, %v5184_v14  ;;  %4272 = vmatprep.mubr.msk.f32.mxu1 %vm231_vm2, %v2873_v61 }
 0x64b   :  { %4270 = vmatprep.subr.msk.mxu1 %vm231_vm2, %v5186_v16  ;;  %4289 = vmatprep.subr.mxu0 %v3232_v28 }
 0x64c   :  { %4290 = vmatpush3.msra.mxu0 %v3232_v28 }
 0x64d   :  { %4291 = vmatprep.subr.mxu0 %v3230_v25  ;;  %v3319_v14 = vpop.permute.xlu1 %3318 }
 0x64e   :  { %4271 = vmatpush3.xpose.msk.msra.mxu1 %vm231_vm2, %v5186_v16  ;;  %4292 = vmatpush3.msra.mxu0 %v3230_v25 }
 0x64f   :  { %4282 = vmatprep.subr.msk.mxu1 %vm231_vm2, %v3065_v24  ;;  %4303 = vmatprep.subr.mxu0 %v5265_v54 }
 0x651   :  { %4273 = vmatmul.mubr.msk.f32.vlgmr.msra.gmra.mxu1 %vm231_vm2, %v2875_v32  ;;  %v3317_v16 = vpop.permute.xlu1 %3316 }
 0x652   :  { %4283 = vmatpush3.xpose.msk.msra.mxu1 %vm231_vm2, %v3065_v24  ;;  %4286 = vmatprep.mubr.msk.f32.mxu1 %vm231_vm2, %v3059_v29 }
 0x653   :  { %4284 = vmatprep.subr.msk.mxu1 %vm231_vm2, %v3063_v0 }
 0x656   :  { %4285 = vmatpush3.xpose.msk.msra.mxu1 %vm231_vm2, %v3063_v0 }
 0x657   :  { %4296 = vmatprep.subr.mxu1 %v3319_v14 }
 0x659   :  { %4287 = vmatmul.mubr.msk.f32.vlgmr.msra.gmra.mxu1 %vm231_vm2, %v3061_v21 }
 0x65a   :  { %4297 = vmatpush3.msra.mxu1 %v3319_v14 }
 0x65b   :  { %4298 = vmatprep.subr.mxu1 %v3317_v16 }
 0x65c   :  { %4299 = vmatpush3.msra.mxu1 %v3317_v16 }
 0x693   :  { %v5277_v56 = vpop.f32.mrf.mxu0 }
 0x695   :  { %v5279_v60 = vpop.f32.mrf.mxu0 }
 0x6c6   :  { %v5281_v59 = vpop.f32.mrf.mxu0 }
 0x6c8   :  { %v5283_v63 = vpop.f32.mrf.mxu0 }
 0x6ce   :  { %v4267_v32 = vpop.f32.mrf.mxu0 }
 0x6cf   :  { %v3150_v61 = vsel %vm4742_vm3, %v4267_v32, -1e+30 }
 0x6d0   :  { %v3160_v39 = vsel %vm594_vm4, %v3150_v61, -inf  ;;  %v2861_v20 = vpop.f32.mrf.mxu0 }
 0x6d1   :  { %v3149_v24 = vsel %vm4752_vm5, %v2861_v20, -1e+30  ;;  %3161 = vmax.xlane.f32.xlu1 %v3160_v39 }
 0x6d2   :  { %v3157_v19 = vsel %vm594_vm4, %v3149_v24, -inf }
 0x6d3   :  { %3158 = vmax.xlane.f32.xlu0 %v3157_v19 }
 0x6d6   :  { %v5303_v29 = vpop.f32.mrf.mxu1 }
 0x6d8   :  { %v5305_v21 = vpop.f32.mrf.mxu1 }
 0x6ff   :  { %v4281_v22 = vpop.f32.mrf.mxu0 }
 0x700   :  { %v5293_v26 = vsel %vm4742_vm3, %v4281_v22, -1e+30 }
 0x701   :  { %v3172_v27 = vsel %vm594_vm4, %v5293_v26, -inf  ;;  %v3047_v2 = vpop.f32.mrf.mxu0 }
 0x702   :  { %v5299_v5 = vsel %vm4752_vm5, %v3047_v2, -1e+30  ;;  %3173 = vmax.xlane.f32.xlu0 %v3172_v27 }
 0x703   :  { %v3169_v0 = vsel %vm594_vm4, %v5299_v5, -inf }
 0x704   :  { %3170 = vmax.xlane.f32.xlu1 %v3169_v0 }
 0x709   :  { %v5307_v25 = vpop.f32.mrf.mxu1 }
 0x70b   :  { %v5309_v28 = vpop.f32.mrf.mxu1 }
 0x711   :  { %v4274_v14 = vpop.f32.mrf.mxu1 }
 0x712   :  { %v5313_v16 = vsel %vm4742_vm3, %v4274_v14, -1e+30 }
 0x713   :  { %v3166_v32 = vsel %vm594_vm4, %v5313_v16, -inf  ;;  %v2954_v39 = vpop.f32.mrf.mxu1 }
 0x714   :  { %v5319_v20 = vsel %vm4752_vm5, %v2954_v39, -1e+30  ;;  %3167 = vmax.xlane.f32.xlu0 %v3166_v32  ;;  %v4492_v39 = vld [vmem:[#allocation2 + $0x30] sm:$0xff] }
 0x715   :  { %v3163_v19 = vsel %vm594_vm4, %v5319_v20, -inf }
 0x718   :  { %3164 = vmax.xlane.f32.xlu0 %v3163_v19  ;;  %v4493_v19 = vld [vmem:[#allocation2 + $0x38] sm:$0xff] }
 0x719   :  { %v4288_v22 = vpop.f32.mrf.mxu1 }
 0x71a   :  { %v5325_v27 = vsel %vm4742_vm3, %v4288_v22, -1e+30  ;;  %v2340_v22 = vsel %vm594_vm4, %v5198_v36, 0.0  ;;  %v1484_v36 = vsel %vm594_vm4, %v5065_v58, 0.0  ;;  %v1490_v58 = vsel %vm594_vm4, %v5048_v37, 0.0 }
 0x71b   :  { %v3178_v2 = vsel %vm594_vm4, %v5325_v27, -inf  ;;  %v3140_v0 = vpop.f32.mrf.mxu1 }
 0x71c   :  { %v5331_v14 = vsel %vm4752_vm5, %v3140_v0, -1e+30  ;;  %3179 = vmax.xlane.f32.xlu0 %v3178_v2  ;;  %v3404_v2 = vpop.permute.xlu1 %3403  ;;  %v1481_v0 = vsel %vm594_vm4, %v5063_v48, 0.0  ;;  %v1487_v48 = vsel %vm594_vm4, %v5046_v52, 0.0  ;;  %v2355_v52 = vsel %vm594_vm4, %v5220_v23, 0.0 }
 0x71d   :  { %v3175_v32 = vsel %vm594_vm4, %v5331_v14, -inf }
 0x71e   :  { %3176 = vmax.xlane.f32.xlu1 %v3175_v32  ;;  %v2343_v32 = vsel %vm594_vm4, %v5202_v8, 0.0  ;;  %v2349_v8 = vsel %vm594_vm4, %v5235_v57, 0.0  ;;  %v2358_v57 = vsel %vm594_vm4, %v5252_v30, 0.0 }
 0x72f   :  { %3490 = vrot.lane.b32.xlu1 %v4492_v39, %s4595_s13 }
 0x732   :  { %3492 = vrot.lane.b32.xlu0 %v4493_v19, %s4595_s13 }
 0x751   :  { %1476 = vadd.xlane.f32.xlu0 %v1475_v47 }
 0x753   :  { %1479 = vadd.xlane.f32.xlu1 %v1478_v53 }
 0x755   :  { %2341 = vadd.xlane.f32.xlu0 %v2340_v22 }
 0x757   :  { %1482 = vadd.xlane.f32.xlu1 %v1481_v0 }
 0x759   :  { %2344 = vadd.xlane.f32.xlu0 %v2343_v32 }
 0x75a   :  { %v3162_v39 = vpop.xlane.xlu1 %3161 }
 0x75b   :  { %2347 = vadd.xlane.f32.xlu1 %v2346_v15  ;;  %v3182_v17 = vsub.f32 %v3150_v61, %v3162_v39  ;;  %v1493_v61 = vsel %vm594_vm4, %v5080_v18, 0.0 }
 0x75c   :  { %v3159_v19 = vpop.xlane.xlu0 %3158 }
 0x75d   :  { %v3191_v47 = vmul.f32 1.442695, %v3182_v17  ;;  %v3181_v53 = vsub.f32 %v3149_v24, %v3159_v19  ;;  %1485 = vadd.xlane.f32.xlu0 %v1484_v36 }
 0x75f   :  { %v3189_v22 = vmul.f32 1.442695, %v3181_v53  ;;  %1488 = vadd.xlane.f32.xlu1 %v1487_v48  ;;  %4412 = vpow2.f32 %v3191_v47 }
 0x761   :  { %4414 = vpow2.f32 %v3189_v22  ;;  %2350 = vadd.xlane.f32.xlu0 %v2349_v8 }
 0x763   :  { %2353 = vadd.xlane.f32.xlu1 %v2352_v62 }
 0x765   :  { %1491 = vadd.xlane.f32.xlu0 %v1490_v58 }
 0x767   :  { %1494 = vadd.xlane.f32.xlu1 %v1493_v61 }
 0x769   :  { %2356 = vadd.xlane.f32.xlu0 %v2355_v52 }
 0x76b   :  { %2359 = vadd.xlane.f32.xlu1 %v2358_v57 }
 0x76c   :  { %v4413_v24 = vpop.eup %4412 }
 0x76d   :  { %1497 = vadd.xlane.f32.xlu0 %v1496_v44  ;;  %v3208_v18 = vsel %vm594_vm4, %v4413_v24, 0.0 }
 0x76e   :  { %v4415_v0 = vpop.eup %4414 }
 0x76f   :  { %4293 = vmatprep.mubr.msk.f32.mxu0 %vm594_vm4, %v4415_v0  ;;  %v3205_v37 = vsel %vm594_vm4, %v4415_v0, 0.0 }
 0x770   :  { %3206 = vadd.xlane.f32.xlu1 %v3205_v37  ;;  %4294 = vmatmul.mubr.msk.f32.vlgmr.msra.gmra.mxu0 %vm594_vm4, %v4413_v24 }
 0x771   :  { %4304 = vmatpush3.msra.mxu0 %v5265_v54  ;;  %3209 = vadd.xlane.f32.xlu0 %v3208_v18 }
 0x772   :  { %4305 = vmatprep.subr.mxu0 %v3404_v2 }
 0x773   :  { %4306 = vmatpush3.msra.mxu0 %v3404_v2 }
 0x78b   :  { %v3174_v23 = vpop.xlane.xlu0 %3173 }
 0x78c   :  { %v3186_v55 = vsub.f32 %v5293_v26, %v3174_v23  ;;  %v649_v23 = vsel %vm594_vm4, %v4862_v51, 0.0  ;;  %v658_v51 = vsel %vm594_vm4, %v4853_v50, 0.0 }
 0x78d   :  { %v3171_v30 = vpop.xlane.xlu1 %3170 }
 0x78e   :  { %v3199_v32 = vmul.f32 1.442695, %v3186_v55  ;;  %v3185_v15 = vsub.f32 %v5299_v5, %v3171_v30  ;;  %v655_v55 = vsel %vm594_vm4, %v4851_v49, 0.0  ;;  %v652_v30 = vsel %vm594_vm4, %v4865_v42, 0.0 }
 0x790   :  { %4416 = vpow2.f32 %v3199_v32  ;;  %v3197_v39 = vmul.f32 1.442695, %v3185_v15  ;;  %v661_v15 = vsel %vm594_vm4, %v4884_v3, 0.0 }
 0x792   :  { %4418 = vpow2.f32 %v3197_v39 }
 0x79d   :  { %v4417_v17 = vpop.eup %4416  ;;  %v3168_v19 = vpop.xlane.xlu0 %3167 }
 0x79e   :  { %v3184_v36 = vsub.f32 %v5313_v16, %v3168_v19  ;;  %v3220_v47 = vsel %vm594_vm4, %v4417_v17, 0.0  ;;  %v643_v16 = vsel %vm594_vm4, %v4842_v45, 0.0  ;;  %v2361_v45 = vsel %vm594_vm4, %v5254_v41, 0.0 }
 0x79f   :  { %v4419_v54 = vpop.eup %4418  ;;  %3221 = vadd.xlane.f32.xlu0 %v3220_v47  ;;  %v646_v41 = vsel %vm594_vm4, %v4844_v46, 0.0  ;;  %v664_v46 = vsel %vm594_vm4, %v4886_v4, 0.0 }
 0x7a0   :  { %v3195_v53 = vmul.f32 1.442695, %v3184_v36  ;;  %4307 = vmatprep.mubr.msk.f32.mxu0 %vm594_vm4, %v4419_v54  ;;  %v3217_v26 = vsel %vm594_vm4, %v4419_v54, 0.0 }
 0x7a1   :  { %v3165_v2 = vpop.xlane.xlu0 %3164  ;;  %4308 = vmatmul.mubr.msk.f32.vlgmr.msra.gmra.mxu0 %vm594_vm4, %v4417_v17  ;;  %3218 = vadd.xlane.f32.xlu1 %v3217_v26 }
 0x7a2   :  { %4420 = vpow2.f32 %v3195_v53  ;;  %v3183_v5 = vsub.f32 %v5319_v20, %v3165_v2 }
 0x7a4   :  { %v3193_v48 = vmul.f32 1.442695, %v3183_v5 }
 0x7a5   :  { %v3180_v22 = vpop.xlane.xlu0 %3179  ;;  %644 = vadd.xlane.f32.xlu1 %v643_v16 }
 0x7a6   :  { %4422 = vpow2.f32 %v3193_v48  ;;  %v3188_v8 = vsub.f32 %v5325_v27, %v3180_v22 }
 0x7a7   :  { %v3177_v62 = vpop.xlane.xlu1 %3176 }
 0x7a8   :  { %v3203_v58 = vmul.f32 1.442695, %v3188_v8  ;;  %v3187_v61 = vsub.f32 %v5331_v14, %v3177_v62 }
 0x7a9   :  { %v3493_v52 = vpop.permute.xlu0 %3492 }
 0x7aa   :  { %4424 = vpow2.f32 %v3203_v58  ;;  %v3201_v57 = vmul.f32 1.442695, %v3187_v61  ;;  %4310 = vmatprep.subr.mxu1 %v3493_v52 }
 0x7ab   :  { %v3491_v14 = vpop.permute.xlu1 %3490 }
 0x7ac   :  { %4426 = vpow2.f32 %v3201_v57 }
 0x7af   :  { %v4421_v44 = vpop.eup %4420 }
 0x7b0   :  { %v3214_v20 = vsel %vm594_vm4, %v4421_v44, 0.0 }
 0x7b1   :  { %3215 = vadd.xlane.f32.xlu0 %v3214_v20 }
 0x7b3   :  { %v4423_v24 = vpop.eup %4422 }
 0x7b4   :  { %4300 = vmatprep.mubr.msk.f32.mxu1 %vm594_vm4, %v4423_v24  ;;  %v3211_v27 = vsel %vm594_vm4, %v4423_v24, 0.0 }
 0x7b5   :  { %4301 = vmatmul.mubr.msk.f32.vlgmr.msra.gmra.mxu1 %vm594_vm4, %v4421_v44  ;;  %2362 = vadd.xlane.f32.xlu0 %v2361_v45 }
 0x7b6   :  { %4311 = vmatpush3.msra.mxu1 %v3493_v52  ;;  %3212 = vadd.xlane.f32.xlu1 %v3211_v27 }
 0x7b7   :  { %v4425_v0 = vpop.eup %4424  ;;  %4312 = vmatprep.subr.mxu1 %v3491_v14 }
 0x7b8   :  { %4313 = vmatpush3.msra.mxu1 %v3491_v14  ;;  %v3226_v37 = vsel %vm594_vm4, %v4425_v0, 0.0 }
 0x7b9   :  { %v4427_v18 = vpop.eup %4426  ;;  %3227 = vadd.xlane.f32.xlu0 %v3226_v37 }
 0x7ba   :  { %650 = vadd.xlane.f32.xlu1 %v649_v23  ;;  %4314 = vmatprep.mubr.msk.f32.mxu1 %vm594_vm4, %v4427_v18  ;;  %v3223_v32 = vsel %vm594_vm4, %v4427_v18, 0.0 }
 0x7bb   :  { %4315 = vmatmul.mubr.msk.f32.vlgmr.msra.gmra.mxu1 %vm594_vm4, %v4425_v0 }
 0x7bd   :  { %647 = vadd.xlane.f32.xlu0 %v646_v41  ;;  %v3645_v41 = vld [vmem:[#allocation9 + $0x18] sm:$0xff] }
 0x7be   :  { %656 = vadd.xlane.f32.xlu1 %v655_v55  ;;  %4317 = vmatprep.subr.mxu0 %v3645_v41 }
 0x7bf   :  { %4318 = vmatpush3.msra.mxu0 %v3645_v41 }
 0x7c1   :  { %653 = vadd.xlane.f32.xlu0 %v652_v30  ;;  %v3643_v30 = vld [vmem:[#allocation9 + $0x8] sm:$0xff] }
 0x7c2   :  { %3224 = vadd.xlane.f32.xlu1 %v3223_v32 }
 0x7c5   :  { %659 = vadd.xlane.f32.xlu0 %v658_v51 }
 0x7c6   :  { %662 = vadd.xlane.f32.xlu1 %v661_v15 }
 0x7c9   :  { %665 = vadd.xlane.f32.xlu0 %v664_v46 }
 0x7da   :  { %v1477_v49 = vpop.xlane.xlu0 %1476 }
 0x7db   :  { %4428 = vrcp.f32 %v1477_v49 }
 0x7dc   :  { %v1480_v39 = vpop.xlane.xlu1 %1479 }
 0x7dd   :  { %4430 = vrcp.f32 %v1480_v39 }
 0x7de   :  { %v2342_v42 = vpop.xlane.xlu0 %2341 }
 0x7df   :  { %4432 = vrcp.f32 %v2342_v42 }
 0x7e0   :  { %v1483_v17 = vpop.xlane.xlu1 %1482 }
 0x7e1   :  { %4434 = vrcp.f32 %v1483_v17 }
 0x7e2   :  { %v2345_v19 = vpop.xlane.xlu0 %2344 }
 0x7e3   :  { %4436 = vrcp.f32 %v2345_v19 }
 0x7e4   :  { %v2348_v50 = vpop.xlane.xlu1 %2347 }
 0x7e5   :  { %4438 = vrcp.f32 %v2348_v50 }
 0x7e6   :  { %v1486_v36 = vpop.xlane.xlu0 %1485 }
 0x7e7   :  { %4440 = vrcp.f32 %v1486_v36 }
 0x7e8   :  { %v4429_v3 = vpop.eup %4428  ;;  %v1489_v47 = vpop.xlane.xlu1 %1488 }
 0x7e9   :  { %4442 = vrcp.f32 %v1489_v47  ;;  %v1855_v4 = vmul.f32 %v4429_v3, %v5110_v34 }
 0x7ea   :  { %v4431_v54 = vpop.eup %4430  ;;  %v2351_v53 = vpop.xlane.xlu0 %2350 }
 0x7eb   :  { %4444 = vrcp.f32 %v2351_v53  ;;  %1871 = vrot.lane.b32.xlu1 %v1855_v4, %s4583_s21  ;;  %v1856_v26 = vmul.f32 %v4431_v54, %v5108_v31 }
 0x7ec   :  { %v4433_v2 = vpop.eup %4432  ;;  %v2354_v5 = vpop.xlane.xlu1 %2353 }
 0x7ed   :  { %4446 = vrcp.f32 %v2354_v5  ;;  %1873 = vrot.lane.b32.xlu0 %v1856_v26, %s4583_s21  ;;  %v2720_v48 = vmul.f32 %v4433_v2, %v5279_v60 }
 0x7ee   :  { %v4435_v16 = vpop.eup %4434  ;;  %v1492_v22 = vpop.xlane.xlu0 %1491 }
 0x7ef   :  { %4448 = vrcp.f32 %v1492_v22  ;;  %2736 = vrot.lane.b32.xlu1 %v2720_v48, %s4596_s14  ;;  %v1857_v34 = vmul.f32 %v4435_v16, %v5136_v6 }
 0x7f0   :  { %v4437_v8 = vpop.eup %4436  ;;  %v1495_v62 = vpop.xlane.xlu1 %1494 }
 0x7f1   :  { %4450 = vrcp.f32 %v1495_v62  ;;  %1875 = vrot.lane.b32.xlu0 %v1857_v34, %s4583_s21  ;;  %v2721_v31 = vmul.f32 %v4437_v8, %v5277_v56 }
 0x7f2   :  { %v4439_v58 = vpop.eup %4438  ;;  %v2357_v61 = vpop.xlane.xlu0 %2356 }
 0x7f3   :  { %4452 = vrcp.f32 %v2357_v61  ;;  %2738 = vrot.lane.b32.xlu1 %v2721_v31, %s4596_s14  ;;  %v2722_v60 = vmul.f32 %v4439_v58, %v5305_v21 }
 0x7f4   :  { %v4441_v52 = vpop.eup %4440  ;;  %v5436_v18 = vpop.xlane.xlu1 %2359 }
 0x7f5   :  { %2740 = vrot.lane.b32.xlu0 %v2722_v60, %s4596_s14  ;;  %v1858_v57 = vmul.f32 %v4441_v52, %v5132_v1 }
 0x7f6   :  { %v4443_v6 = vpop.eup %4442  ;;  %v1498_v44 = vpop.xlane.xlu0 %1497 }
 0x7f7   :  { %4454 = vrcp.f32 %v1498_v44  ;;  %1877 = vrot.lane.b32.xlu1 %v1858_v57, %s4583_s21  ;;  %v1859_v20 = vmul.f32 %v4443_v6, %v5114_v43 }
 0x7f8   :  { %v4445_v56 = vpop.eup %4444 }
 0x7f9   :  { %1879 = vrot.lane.b32.xlu0 %v1859_v20, %s4583_s21  ;;  %v2723_v24 = vmul.f32 %v4445_v56, %v5303_v29  ;;  %v3207_v23 = vpop.xlane.xlu1 %3206  ;;  %v5541_v56 = vld [vmem:[#allocation14_spill] sm:$0xff] }
 0x7fa   :  { %v4447_v45 = vpop.eup %4446 }
 0x7fb   :  { %2742 = vrot.lane.b32.xlu1 %v2723_v24, %s4596_s14  ;;  %v2724_v21 = vmul.f32 %v4447_v45, %v5283_v63 }
 0x7fc   :  { %v4449_v27 = vpop.eup %4448 }
 0x7fd   :  { %2744 = vrot.lane.b32.xlu0 %v2724_v21, %s4596_s14  ;;  %v1860_v1 = vmul.f32 %v4449_v27, %v5112_v40  ;;  %v3210_v40 = vpop.xlane.xlu0 %3209 }
 0x7fe   :  { %v4451_v14 = vpop.eup %4450  ;;  %4456 = vrcp.f32 %v3210_v40 }
 0x7ff   :  { %1881 = vrot.lane.b32.xlu1 %v1860_v1, %s4583_s21  ;;  %v1861_v43 = vmul.f32 %v4451_v14, %v5140_v9  ;;  %4458 = vrcp.f32 %v3207_v23  ;;  %v3644_v9 = vld [vmem:[#allocation9 + $0x10] sm:$0xff] }
 0x800   :  { %v4453_v0 = vpop.eup %4452  ;;  %4319 = vmatprep.subr.mxu0 %v3644_v9 }
 0x801   :  { %1883 = vrot.lane.b32.xlu0 %v1861_v43, %s4583_s21  ;;  %v2725_v29 = vmul.f32 %v4453_v0, %v5281_v59  ;;  %4320 = vmatpush3.msra.mxu0 %v3644_v9  ;;  %v3642_v59 = vld [vmem:[#allocation9] sm:$0xff] }
 0x802   :  { %4321 = vmatprep.subr.mxu0 %v3643_v30 }
 0x803   :  { %2746 = vrot.lane.b32.xlu1 %v2725_v29, %s4596_s14  ;;  %4322 = vmatpush3.msra.mxu0 %v3643_v30 }
 0x804   :  { %v4455_v37 = vpop.eup %4454  ;;  %4323 = vmatprep.subr.mxu0 %v3642_v59 }
 0x805   :  { %v1862_v63 = vmul.f32 %v4455_v37, %v5138_v7  ;;  %4324 = vmatpush3.msra.mxu0 %v3642_v59 }
 0x807   :  { %1885 = vrot.lane.b32.xlu1 %v1862_v63, %s4583_s21 }
 0x80b   :  { %v4457_v7 = vpop.eup %4456 }
 0x80c   :  { %v4459_v46 = vpop.eup %4458 }
 0x828   :  { %v3222_v42 = vpop.xlane.xlu0 %3221 }
 0x82a   :  { %v3219_v55 = vpop.xlane.xlu1 %3218 }
 0x82e   :  { %v645_v32 = vpop.xlane.xlu1 %644 }
 0x82f   :  { %4460 = vrcp.f32 %v645_v32 }
 0x830   :  { %v4295_v51 = vpop.f32.mrf.mxu0 }
 0x831   :  { %v3586_v15 = vmul.f32 %v4457_v7, %v4295_v51 }
 0x832   :  { %v3307_v49 = vpop.f32.mrf.mxu0 }
 0x833   :  { %v3585_v39 = vmul.f32 %v4459_v46, %v3307_v49  ;;  %3603 = vrot.lane.b32.xlu1 %v3586_v15, %s4597_s15 }
 0x835   :  { %3601 = vrot.lane.b32.xlu0 %v3585_v39, %s4597_s15 }
 0x83a   :  { %v5440_v17 = vpop.xlane.xlu0 %3215 }
 0x83c   :  { %v4461_v19 = vpop.eup %4460 }
 0x83d   :  { %v1023_v50 = vmul.f32 %v4461_v19, %v4914_v11 }
 0x83e   :  { %v5443_v36 = vpop.xlane.xlu0 %2362 }
 0x83f   :  { %v5445_v3 = vpop.xlane.xlu1 %3212  ;;  %1031 = vst.msk [vmem:[#allocation3] sm:$0xff] %vm231_vm2, %v1023_v50 }
 0x842   :  { %v5448_v47 = vpop.xlane.xlu0 %3227 }
 0x843   :  { %v651_v4 = vpop.xlane.xlu1 %650 }
 0x844   :  { %4462 = vrcp.f32 %v651_v4 }
 0x846   :  { %v648_v54 = vpop.xlane.xlu0 %647 }
 0x847   :  { %4464 = vrcp.f32 %v648_v54  ;;  %v657_v53 = vpop.xlane.xlu1 %656 }
 0x848   :  { %4466 = vrcp.f32 %v657_v53 }
 0x84a   :  { %v654_v26 = vpop.xlane.xlu0 %653 }
 0x84b   :  { %4468 = vrcp.f32 %v654_v26  ;;  %v5450_v2 = vpop.xlane.xlu1 %3224 }
 0x84e   :  { %v660_v5 = vpop.xlane.xlu0 %659 }
 0x84f   :  { %4470 = vrcp.f32 %v660_v5  ;;  %v663_v11 = vpop.xlane.xlu1 %662 }
 0x850   :  { %4472 = vrcp.f32 %v663_v11 }
 0x851   :  { %v4463_v48 = vpop.eup %4462 }
 0x852   :  { %v666_v16 = vpop.xlane.xlu0 %665  ;;  %v1025_v22 = vmul.f32 %v4463_v48, %v4946_v35 }
 0x853   :  { %4474 = vrcp.f32 %v666_v16 }
 0x854   :  { %v4465_v34 = vpop.eup %4464  ;;  %4476 = vrcp.f32 %v3222_v42  ;;  %1033 = vst.msk [vmem:[#allocation3 + $0x10] sm:$0xff] %vm231_vm2, %v1025_v22 }
 0x855   :  { %v4467_v8 = vpop.eup %4466  ;;  %v1024_v62 = vmul.f32 %v4465_v34, %v4912_v10  ;;  %4478 = vrcp.f32 %v3219_v55 }
 0x856   :  { %v1027_v31 = vmul.f32 %v4467_v8, %v4918_v13  ;;  %4480 = vrcp.f32 %v5440_v17 }
 0x857   :  { %1032 = vst.msk [vmem:[#allocation3 + $0x8] sm:$0xff] %vm231_vm2, %v1024_v62  ;;  %4482 = vrcp.f32 %v5443_v36 }
 0x858   :  { %v4469_v58 = vpop.eup %4468  ;;  %1035 = vst.msk [vmem:[#allocation3 + $0x20] sm:$0xff] %vm231_vm2, %v1027_v31  ;;  %4484 = vrcp.f32 %v5445_v3  ;;  %v3912_v31 = vld [vmem:[%s5534_s3] ss:$0 sm:$0xff]  ;;  %s4598_s3 = smov [#allocation10]  }
 0x859   :  { %v1026_v61 = vmul.f32 %v4469_v58, %v4942_v33  ;;  %4486 = vrcp.f32 %v5436_v18  ;;  %s3795_s18 = sshll.u32 %s4598_s3, 4  ;;  %s3796_s18 = int_to_ptr.vmem [resolvable:$true] %s3795_s18 }
 0x85a   :  { %4488 = vrcp.f32 %v5448_v47  ;;  %s4554_s19 = scalar_lea.vmem %s3796_s18, 1024  ;;  %p4559_p2 = scmp.lt.s32.totalorder %s3796_s18, %s3796_s18 }
 0x85b   :  { %1034 = vst.msk [vmem:[#allocation3 + $0x18] sm:$0xff] %vm231_vm2, %v1026_v61  ;;  %4490 = vrcp.f32 %v5450_v2  ;;  %p4555_p1 = scmp.ne.s32.totalorder %s3796_s18, %s4554_s19  ;;  %p4560_p3 = scmp.lt.s32.totalorder %s4554_s19, %s4554_s19 }
 0x85c   :  { %v4471_v35 = vpop.eup %4470 }
 0x85d   :  { %v4473_v60 = vpop.eup %4472  ;;  %v1872_v52 = vpop.permute.xlu1 %1871  ;;  %v1028_v57 = vmul.f32 %v4471_v35, %v4916_v12  ;;  %p4561_p4 = por %p4560_p3, %p4559_p2 }
 0x85e   :  { %1896 = vst.msk [vmem:[#allocation3] sm:$0xff] %vm1895_vm6, %v1872_v52  ;;  %v1029_v10 = vmul.f32 %v4473_v60, %v4950_v38 }
 0x85f   :  { %v1874_v13 = vpop.permute.xlu0 %1873  ;;  %1036 = vst.msk [vmem:[#allocation3 + $0x28] sm:$0xff] %vm231_vm2, %v1028_v57  ;;  %p4562_p5 = pnand %p4561_p4, %p4555_p1 }
 0x860   :  { %v4475_v6 = vpop.eup %4474  ;;  %1897 = vst.msk [vmem:[#allocation3 + $0x8] sm:$0xff] %vm1895_vm6, %v1874_v13 }
 0x861   :  { %1037 = vst.msk [vmem:[#allocation3 + $0x30] sm:$0xff] %vm231_vm2, %v1029_v10  ;;  %v4477_v33 = vpop.eup %4476  ;;  %v2737_v44 = vpop.permute.xlu1 %2736  ;;  %v1030_v24 = vmul.f32 %v4475_v6, %v5541_v56 }
 0x862   :  { %v4309_v20 = vpop.f32.mrf.mxu0  ;;  %2761 = vst.msk [vmem:[#allocation3] sm:$0xff] %vm2760_vm7, %v2737_v44  ;;  %v4479_v45 = vpop.eup %4478 }
 0x863   :  { %v3590_v12 = vmul.f32 %v4477_v33, %v4309_v20  ;;  %v1876_v21 = vpop.permute.xlu0 %1875  ;;  %1038 = vst.msk [vmem:[#allocation3 + $0x38] sm:$0xff] %vm231_vm2, %v1030_v24  ;;  %v4481_v23 = vpop.eup %4480 }
 0x864   :  { %v3481_v38 = vpop.f32.mrf.mxu0  ;;  %1898 = vst.msk [vmem:[#allocation3 + $0x10] sm:$0xff] %vm1895_vm6, %v1876_v21  ;;  %v4483_v9 = vpop.eup %4482 }
 0x865   :  { %v3589_v27 = vmul.f32 %v4479_v45, %v3481_v38  ;;  %3611 = vrot.lane.b32.xlu1 %v3590_v12, %s4597_s15  ;;  %v2739_v1 = vpop.permute.xlu1 %2738  ;;  %v4485_v30 = vpop.eup %4484  ;;  %v2727_v15 = vmul.f32 %v4483_v9, %v5307_v25 }
 0x866   :  { %2762 = vst.msk [vmem:[#allocation3 + $0x8] sm:$0xff] %vm2760_vm7, %v2739_v1  ;;  %v4487_v7 = vpop.eup %4486 }
 0x867   :  { %3609 = vrot.lane.b32.xlu0 %v3589_v27, %s4597_s15  ;;  %v2741_v14 = vpop.permute.xlu0 %2740  ;;  %v2726_v49 = vmul.f32 %v4487_v7, %v5309_v28  ;;  %v4489_v39 = vpop.eup %4488 }
 0x868   :  { %2763 = vst.msk [vmem:[#allocation3 + $0x10] sm:$0xff] %vm2760_vm7, %v2741_v14  ;;  %v4491_v19 = vpop.eup %4490 }
 0x869   :  { %v1878_v43 = vpop.permute.xlu1 %1877 }
 0x86a   :  { %1899 = vst.msk [vmem:[#allocation3 + $0x18] sm:$0xff] %vm1895_vm6, %v1878_v43 }
 0x86b   :  { %v1880_v0 = vpop.permute.xlu0 %1879 }
 0x86c   :  { %1900 = vst.msk [vmem:[#allocation3 + $0x20] sm:$0xff] %vm1895_vm6, %v1880_v0 }
 0x86d   :  { %v2743_v29 = vpop.permute.xlu1 %2742 }
 0x86e   :  { %2764 = vst.msk [vmem:[#allocation3 + $0x18] sm:$0xff] %vm2760_vm7, %v2743_v29 }
 0x86f   :  { %v2745_v37 = vpop.permute.xlu0 %2744 }
 0x870   :  { %2765 = vst.msk [vmem:[#allocation3 + $0x20] sm:$0xff] %vm2760_vm7, %v2745_v37 }
 0x871   :  { %v1882_v63 = vpop.permute.xlu1 %1881 }
 0x872   :  { %1901 = vst.msk [vmem:[#allocation3 + $0x28] sm:$0xff] %vm1895_vm6, %v1882_v63 }
 0x873   :  { %v1884_v40 = vpop.permute.xlu0 %1883 }
 0x874   :  { %1902 = vst.msk [vmem:[#allocation3 + $0x30] sm:$0xff] %vm1895_vm6, %v1884_v40 }
 0x875   :  { %v4302_v18 = vpop.f32.mrf.mxu1  ;;  %v2747_v41 = vpop.permute.xlu1 %2746 }
 0x876   :  { %v3588_v55 = vmul.f32 %v4481_v23, %v4302_v18  ;;  %2766 = vst.msk [vmem:[#allocation3 + $0x28] sm:$0xff] %vm2760_vm7, %v2747_v41 }
 0x877   :  { %v3394_v59 = vpop.f32.mrf.mxu1 }
 0x878   :  { %v3587_v32 = vmul.f32 %v4485_v30, %v3394_v59  ;;  %3607 = vrot.lane.b32.xlu1 %v3588_v55, %s4597_s15 }
 0x879   :  { %v1886_v51 = vpop.permute.xlu1 %1885 }
 0x87a   :  { %1903 = vst.msk [vmem:[#allocation3 + $0x38] sm:$0xff] %vm1895_vm6, %v1886_v51  ;;  %3605 = vrot.lane.b32.xlu0 %v3587_v32, %s4597_s15 }
 0x87b   :  { %v4316_v46 = vpop.f32.mrf.mxu1 }
 0x87c   :  { %2750 = vrot.lane.b32.xlu1 %v2727_v15, %s4596_s14  ;;  %v3592_v17 = vmul.f32 %v4489_v39, %v4316_v46 }
 0x87d   :  { %v3568_v42 = vpop.f32.mrf.mxu1 }
 0x87e   :  { %2748 = vrot.lane.b32.xlu0 %v2726_v49, %s4596_s14  ;;  %v3591_v50 = vmul.f32 %v4491_v19, %v3568_v42 }
 0x880   :  { %3615 = vrot.lane.b32.xlu1 %v3592_v17, %s4597_s15 }
 0x882   :  { %3613 = vrot.lane.b32.xlu0 %v3591_v50, %s4597_s15 }
 0x8a5   :  { %v3604_v36 = vpop.permute.xlu1 %3603 }
 0x8a6   :  { %3627 = vst.msk [vmem:[#allocation3 + $0x8] sm:$0xff] %vm3625_vm8, %v3604_v36 }
 0x8a7   :  { %v3602_v25 = vpop.permute.xlu0 %3601 }
 0x8a8   :  { %3626 = vst.msk [vmem:[#allocation3] sm:$0xff] %vm3625_vm8, %v3602_v25 }
 0x8ad   :  { %v3635_v28 = vld [vmem:[#allocation3 + $0x8] sm:$0xff] }
 0x8af   :  { %v3634_v3 = vld [vmem:[#allocation3] sm:$0xff] }
 0x8b0   :  { %4325 = vmatprep.mubr.msk.f32.mxu0 %vm71_vm0, %v3634_v3 }
 0x8b1   :  { %4326 = vmatmul.mubr.msk.f32.vlgmr.msra.gmra.mxu0 %vm71_vm0, %v3635_v28 }
 0x8d7   :  { %v3612_v47 = vpop.permute.xlu1 %3611 }
 0x8d8   :  { %3631 = vst.msk [vmem:[#allocation3 + $0x28] sm:$0xff] %vm3625_vm8, %v3612_v47 }
 0x8d9   :  { %v3610_v4 = vpop.permute.xlu0 %3609 }
 0x8da   :  { %3630 = vst.msk [vmem:[#allocation3 + $0x20] sm:$0xff] %vm3625_vm8, %v3610_v4 }
 0x8df   :  { %v3639_v34 = vld [vmem:[#allocation3 + $0x28] sm:$0xff] }
 0x8e1   :  { %v3638_v22 = vld [vmem:[#allocation3 + $0x20] sm:$0xff] }
 0x8ea   :  { %v3608_v54 = vpop.permute.xlu1 %3607 }
 0x8eb   :  { %3629 = vst.msk [vmem:[#allocation3 + $0x18] sm:$0xff] %vm3625_vm8, %v3608_v54 }
 0x8ec   :  { %v3606_v53 = vpop.permute.xlu0 %3605 }
 0x8ed   :  { %3628 = vst.msk [vmem:[#allocation3 + $0x10] sm:$0xff] %vm3625_vm8, %v3606_v53 }
 0x8ee   :  { %v2751_v26 = vpop.permute.xlu1 %2750 }
 0x8ef   :  { %2768 = vst.msk [vmem:[#allocation3 + $0x38] sm:$0xff] %vm2760_vm7, %v2751_v26 }
 0x8f0   :  { %v2749_v2 = vpop.permute.xlu0 %2748 }
 0x8f1   :  { %2767 = vst.msk [vmem:[#allocation3 + $0x30] sm:$0xff] %vm2760_vm7, %v2749_v2 }
 0x8f2   :  { %v3616_v5 = vpop.permute.xlu1 %3615  ;;  %v3637_v16 = vld [vmem:[#allocation3 + $0x18] sm:$0xff] }
 0x8f3   :  { %3633 = vst.msk [vmem:[#allocation3 + $0x38] sm:$0xff] %vm3625_vm8, %v3616_v5 }
 0x8f4   :  { %v3614_v11 = vpop.permute.xlu0 %3613  ;;  %v3636_v48 = vld [vmem:[#allocation3 + $0x10] sm:$0xff] }
 0x8f5   :  { %3632 = vst.msk [vmem:[#allocation3 + $0x30] sm:$0xff] %vm3625_vm8, %v3614_v11  ;;  %4328 = vmatprep.mubr.msk.f32.mxu0 %vm71_vm0, %v3636_v48 }
 0x8f6   :  { %4329 = vmatmul.mubr.msk.f32.gmra.mxu0 %vm71_vm0, %v3637_v16 }
 0x8f7   :  { %4331 = vmatprep.mubr.msk.f32.mxu0 %vm71_vm0, %v3638_v22 }
 0x8fa   :  { %4332 = vmatmul.mubr.msk.f32.gmra.mxu0 %vm71_vm0, %v3639_v34  ;;  %v3641_v62 = vld [vmem:[#allocation3 + $0x38] sm:$0xff] }
 0x8fc   :  { %v3640_v8 = vld [vmem:[#allocation3 + $0x30] sm:$0xff] }
 0x8fd   :  { %4334 = vmatprep.mubr.msk.f32.mxu0 %vm71_vm0, %v3640_v8 }
 0x8fe   :  { %4335 = vmatmul.mubr.msk.f32.gmra.mxu0 %vm71_vm0, %v3641_v62 }
 0x971   :  { %v4327_v58 = vpop.f32.mrf.mxu0 }
 0x972   :  { %v3749_v61 = vadd.f32 %v4327_v58, %v3912_v31 }
 0x973   :  { %v3743_v35 = vpop.f32.mrf.mxu0 }
 0x974   :  { %3783 = vst.msk [vmem:[#allocation10 + $0x8] sm:$0xff] %vm71_vm0, %v3749_v61  ;;  %v3744_v60 = vadd.f32 %v3912_v31, %v3743_v35 }
 0x976   :  { %3782 = vst.msk [vmem:[#allocation10] sm:$0xff] %vm71_vm0, %v3744_v60 }
 0x9b6   :  { %v4330_v52 = vpop.f32.mrf.mxu0 }
 0x9b7   :  { %v3759_v57 = vadd.f32 %v4330_v52, %v3912_v31 }
 0x9b8   :  { %v3753_v10 = vpop.f32.mrf.mxu0 }
 0x9b9   :  { %3785 = vst.msk [vmem:[#allocation10 + $0x18] sm:$0xff] %vm71_vm0, %v3759_v57  ;;  %v3754_v13 = vadd.f32 %v3912_v31, %v3753_v10 }
 0x9ba   :  { %v4333_v6 = vpop.f32.mrf.mxu0 }
 0x9bb   :  { %3784 = vst.msk [vmem:[#allocation10 + $0x10] sm:$0xff] %vm71_vm0, %v3754_v13  ;;  %v3769_v33 = vadd.f32 %v4333_v6, %v3912_v31 }
 0x9bc   :  { %v3763_v44 = vpop.f32.mrf.mxu0 }
 0x9bd   :  { %3787 = vst.msk [vmem:[#allocation10 + $0x28] sm:$0xff] %vm71_vm0, %v3769_v33  ;;  %v3764_v20 = vadd.f32 %v3912_v31, %v3763_v44 }
 0x9be   :  { %v4336_v56 = vpop.f32.mrf.mxu0 }
 0x9bf   :  { %3786 = vst.msk [vmem:[#allocation10 + $0x20] sm:$0xff] %vm71_vm0, %v3764_v20  ;;  %v3779_v24 = vadd.f32 %v4336_v56, %v3912_v31 }
 0x9c0   :  { %v3773_v12 = vpop.f32.mrf.mxu0 }
 0x9c1   :  { %3789 = vst.msk [vmem:[#allocation10 + $0x38] sm:$0xff] %vm71_vm0, %v3779_v24  ;;  %v3774_v45 = vadd.f32 %v3912_v31, %v3773_v12 }
 0x9c3   :  { %3788 = vst.msk [vmem:[#allocation10 + $0x30] sm:$0xff] %vm71_vm0, %v3774_v45 }
 0x9c4   :  { %4565 = shalt.err (!%p4562_p5)
}
 0x9c5   :  { %3801 = dma.vmem_to_hbm [thread:$0]  %s3796_s18, 1024, %s5535_s4, [#allocation6], %s4582_s20, %s4582_s20, %s4583_s21  }
 0x9c6   :  { %4578 = dma.done.wait [#allocation6], 1024  }
 0x9c7   :  { %4579 = vsyncadd [#allocation6], 4294966272 }
 0x9c8   :  { %3805 = vsyncpa [#allocation5], 1 }
 0x9c9   :  { %3806 = vsyncpa [#allocation8], 1 }
 0x9ca   :  { %3807 = vsyncpa [#allocation6], 1 }

</bundles_post_ra>
